<compile_context>
chip_gen: v7x
topology: tpu7x:2x2x1
jax: 0.10.0
libtpu: 0.0.40
codegen_flags: <defaults>
</compile_context>

<pallas_src>
import functools

import jax
import jax.numpy as jnp
from jax.experimental import pallas as pl
from jax.experimental.pallas import tpu as pltpu

_LANE = 128   # vreg lane width
_SUB = 8      # vreg sublane width


def _round_up(x, m):
    return ((x + m - 1) // m) * m


def _smooth_l1(d):
    # F.smooth_l1_loss elementwise term with default beta=1.0
    ad = jnp.abs(d)
    return jnp.where(ad < 1.0, 0.5 * d * d, ad - 0.5)


def _geo_loss_kernel(x_ref, t_ref, loss_ref, lossc_ref):
    # x_ref: (N, D, G) predictions, t_ref: (D, M, G) targets.  G (items) sits
    # on the lane axis so every (N, M, G) temporary is lane-dense.
    pred = x_ref[...].astype(jnp.float32)      # (N, D, G)
    tag = t_ref[...].astype(jnp.float32)       # (D, M, G)
    N, D, G = pred.shape
    M = tag.shape[1]

    # Pairwise squared distances (N, M, G).  D (=3) is unrolled into plain VPU
    # mul-adds; pred slices are (N, 1, G) (sublane slice) and tag slices are
    # (1, M, G) (free leading expand), so both broadcasts avoid the lane axis.
    diff = None
    for d in range(D):
        delta = pred[:, d:d + 1, :] - tag[d][None]           # (N, M, G)
        sq = delta * delta
        diff = sq if diff is None else diff + sq

    # First-occurrence argmin along M (matches torch.argmin tie-breaking).
    # NOTE: an all-NaN row yields an all-False onehot (contributes 0) instead
    # of propagating NaN like torch would.
    minval = jnp.min(diff, axis=1, keepdims=True)            # (N, 1, G)
    col = jax.lax.broadcasted_iota(jnp.int32, (1, M, G), 1)  # N-invariant iota
    minidx = jnp.min(jnp.where(diff == minval, col, M),
                     axis=1, keepdims=True)                  # (N, 1, G)
    onehot = col == minidx                                   # (N, M, G); one True per (n, g)

    # Gather the matched target per coordinate (VPU select + sublane reduce)
    # and apply smooth-L1 only to the small matched deltas -- the old
    # per-candidate smooth-L1 over all (n, m) pairs is gone.
    sl_sum = None
    for d in range(D):
        t_sel = jnp.sum(jnp.where(onehot, tag[d][None], 0.0),
                        axis=1, keepdims=True)               # (N, 1, G)
        sl = _smooth_l1(pred[:, d:d + 1, :] - t_sel)         # (N, 1, G)
        sl_sum = sl if sl_sum is None else sl_sum + sl

    # mean over (N, D) of smooth_l1(pred - tag[argmin]) per item.
    per_item = jnp.sum(jnp.sum(sl_sum, axis=1), axis=0) * (1.0 / (N * D))  # (G,)
    loss_ref[...] = per_item[None, :].astype(loss_ref.dtype)

    # Centroid smooth-L1 per item (summed over D): one (b, i) slice of
    # F.smooth_l1_loss(prec, tarc, reduction='sum').
    pc = jnp.mean(pred, axis=0)                 # (D, G)
    tc = jnp.mean(tag, axis=1)                  # (D, G)
    lossc_ref[...] = jnp.sum(_smooth_l1(pc - tc), axis=0,
                             keepdims=True).astype(lossc_ref.dtype)


@functools.partial(jax.jit, static_argnames=("block_items",))
def geometric_reconstruction_loss(X_v, target_X_v, weights, *, block_items=512):
    B, I, N, D = X_v.shape
    M = target_X_v.shape[2]
    assert target_X_v.shape == (B, I, M, D)
    assert weights.shape == (B, I)
    BI = B * I

    # ---- generation-aware VMEM budget ------------------------------------
    try:
        vmem_cap = int(pltpu.get_tpu_info().vmem_capacity_bytes)
    except Exception:  # not a TPU / older API: be conservative (v7x = 64 MiB)
        vmem_cap = 64 * 1024 * 1024
    vmem_limit = max(32 << 20, min(vmem_cap - (16 << 20), 100 << 20))
    temp_budget = vmem_limit // 3  # headroom for dbl-buffered inputs + compiler scratch

    # Live f32 temporaries of shape (N, M, G): diff, delta, delta^2, eq-mask,
    # where-result, onehot, masked gather + margin -> ~10 slabs; plus the
    # (N, D, G) / (D, M, G) input blocks (double-buffered) and their f32 casts.
    mp = _round_up(M, _SUB)
    slab = N * mp * 4
    per_item_bytes = 10 * slab + 3 * (N * _SUB + D * mp) * 4
    g_cap = max(_SUB, int(temp_budget // per_item_bytes))

    # ---- choose G (items per grid step) -----------------------------------
    G = min(block_items, BI, g_cap)
    if G >= _LANE:
        G = (G // _LANE) * _LANE          # lane-dense blocks / outputs
    elif G < BI:
        G = max(_SUB, (G // _SUB) * _SUB)
        # TODO(synk): for very large N*M (g_cap < 128) tile M online inside the
        # kernel (running min/argmin + matched-target accumulator) instead of
        # shrinking G below a full lane.
    else:
        G = BI                            # tiny problem: single step
    steps = pl.cdiv(BI, G)

    # Split a single step in two only on chips with 2 TensorCores per device
    # so both cores get work; on 1-TC chips (v5e/v6e) a split only adds
    # per-step overhead.  (Rounding `steps` up to even never changes
    # ceil(steps/2), so it is skipped to save the extra padded DMA.)
    try:
        kind = jax.devices()[0].device_kind.lower()
    except Exception:
        kind = ""
    two_tc = any(t in kind for t in ("v4", "v5p", "v7"))
    if two_tc and steps == 1 and BI >= 2 * _SUB:
        steps = 2
        G = _round_up(pl.cdiv(BI, 2), _SUB)

    BIp = steps * G

    # ---- one relayout per input into the kernel's lane-dense layout -------
    x = X_v.reshape(BI, N, D)
    t = target_X_v.reshape(BI, M, D)
    w = weights.reshape(BI).astype(jnp.float32)
    if BIp != BI:
        pad = BIp - BI
        # Zero-padded items produce zero loss / lossc and carry zero weight.
        x = jnp.pad(x, ((0, pad), (0, 0), (0, 0)))
        t = jnp.pad(t, ((0, pad), (0, 0), (0, 0)))
        w = jnp.pad(w, ((0, pad),))
    x = jnp.transpose(x.reshape(steps, G, N, D), (0, 2, 3, 1))   # (steps, N, D, G)
    t = jnp.transpose(t.reshape(steps, G, M, D), (0, 3, 2, 1))   # (steps, D, M, G)
    w2 = w.reshape(steps, G)

    loss_rows, lossc_rows = pl.pallas_call(
        _geo_loss_kernel,
        out_shape=(
            jax.ShapeDtypeStruct((steps, G), jnp.float32),
            jax.ShapeDtypeStruct((steps, G), jnp.float32),
        ),
        grid_spec=pltpu.PrefetchScalarGridSpec(
            num_scalar_prefetch=0,
            grid=(steps,),
            in_specs=[
                pl.BlockSpec((None, N, D, G), lambda s: (s, 0, 0, 0)),
                pl.BlockSpec((None, D, M, G), lambda s: (s, 0, 0, 0)),
            ],
            out_specs=[
                pl.BlockSpec((1, G), lambda s: (s, 0)),
                pl.BlockSpec((1, G), lambda s: (s, 0)),
            ],
        ),
        compiler_params=pltpu.CompilerParams(
            dimension_semantics=("parallel",),
            vmem_limit_bytes=int(vmem_limit),
        ),
    )(x, t)

    # Weights applied here (one tiny VPU mul + sum) -> no per-step weight DMA.
    loss = jnp.sum(loss_rows * w2) / B      # sum(per_item * weights) / target_X_v.shape[0]
    # torch hardcodes `prec.shape[0] * 3` (3 == D for 3-D points); mirrored exactly.
    lossc = jnp.sum(lossc_rows) / (B * 3)
    # TODO(synk): `losstc` is computed in the torch module but never returned; omitted.
    return loss, lossc


def _reference(X_v, target_X_v, weights):
    """Pure-JAX mirror of the torch forward (for verification)."""
    def per(pred, tag):
        diff = jnp.sum((pred[:, None, :] - tag[None, :, :]) ** 2, axis=-1)
        minv = jnp.argmin(diff, axis=1)
        tagp = tag[minv]
        return jnp.mean(_smooth_l1(pred - tagp))

    B = X_v.shape[0]
    lm = jax.vmap(jax.vmap(per))(X_v, target_X_v)
    loss = jnp.sum(lm * weights) / B
    prec = jnp.mean(X_v, axis=2)
    tarc = jnp.mean(target_X_v, axis=2)
    lossc = jnp.sum(_smooth_l1(prec - tarc)) / (B * 3)
    return loss, lossc


if __name__ == "__main__":
    key = jax.random.PRNGKey(0)
    B, I, N, M, D = 2, 4, 8, 16, 3
    k1, k2, k3 = jax.random.split(key, 3)
    X_v = jax.random.normal(k1, (B, I, N, D), dtype=jnp.float32)
    target_X_v = jax.random.normal(k2, (B, I, M, D), dtype=jnp.float32)
    weights = jax.random.uniform(k3, (B, I), dtype=jnp.float32)

    loss, lossc = geometric_reconstruction_loss(X_v, target_X_v, weights)
    jax.block_until_ready((loss, lossc))

    ref_loss, ref_lossc = _reference(X_v, target_X_v, weights)
    assert jnp.allclose(loss, ref_loss, rtol=1e-5, atol=1e-5), (loss, ref_loss)
    assert jnp.allclose(lossc, ref_lossc, rtol=1e-5, atol=1e-5), (lossc, ref_lossc)

    print("KERNEL_OK")
</pallas_src>

<mosaic_0001>
module attributes {stable_mosaic.version = 11 : i64} {
  func.func @_geo_loss_kernel(%arg0: i32, %arg1: memref<1x8x3x8xf32, #tpu.memory_space<vmem>>, %arg2: memref<1x3x16x8xf32, #tpu.memory_space<vmem>>, %arg3: memref<1x8xf32, #tpu.memory_space<vmem>>, %arg4: memref<1x8xf32, #tpu.memory_space<vmem>>) attributes {dimension_semantics = [#tpu.dimension_semantics<parallel>], iteration_bounds = array<i64: 1>, scalar_prefetch = 0 : i64, scratch_operands = 0 : i64, tpu.core_type = #tpu.core_type<tc>, window_params = [{transform_indices = @transform_0, window_bounds = array<i64: 1, 8, 3, 8>}, {transform_indices = @transform_1, window_bounds = array<i64: 1, 3, 16, 8>}, {transform_indices = @transform_2, window_bounds = array<i64: 1, 8>}, {transform_indices = @transform_3, window_bounds = array<i64: 1, 8>}]} {
    %c0 = arith.constant 0 : index
    %c0_0 = arith.constant 0 : index
    %c0_1 = arith.constant 0 : index
    %c0_2 = arith.constant 0 : index
    %0 = vector.load %arg1[%c0, %c0_0, %c0_1, %c0_2] : memref<1x8x3x8xf32, #tpu.memory_space<vmem>>, vector<1x8x3x8xf32>
    %1 = vector.shape_cast %0 : vector<1x8x3x8xf32> to vector<8x3x8xf32>
    %c0_3 = arith.constant 0 : index
    %c0_4 = arith.constant 0 : index
    %c0_5 = arith.constant 0 : index
    %c0_6 = arith.constant 0 : index
    %2 = vector.load %arg2[%c0_3, %c0_4, %c0_5, %c0_6] : memref<1x3x16x8xf32, #tpu.memory_space<vmem>>, vector<1x3x16x8xf32>
    %3 = vector.shape_cast %2 : vector<1x3x16x8xf32> to vector<3x16x8xf32>
    %4 = vector.extract_strided_slice %1 {offsets = [0, 0, 0], sizes = [8, 1, 8], strides = [1, 1, 1]} : vector<8x3x8xf32> to vector<8x1x8xf32>
    %5 = vector.extract_strided_slice %3 {offsets = [0, 0, 0], sizes = [1, 16, 8], strides = [1, 1, 1]} : vector<3x16x8xf32> to vector<1x16x8xf32>
    %6 = vector.shape_cast %5 : vector<1x16x8xf32> to vector<16x8xf32>
    %7 = vector.shape_cast %6 : vector<16x8xf32> to vector<1x16x8xf32>
    %8 = vector.broadcast %4 : vector<8x1x8xf32> to vector<8x16x8xf32>
    %9 = vector.broadcast %7 : vector<1x16x8xf32> to vector<8x16x8xf32>
    %10 = arith.subf %8, %9 : vector<8x16x8xf32>
    %11 = arith.mulf %10, %10 : vector<8x16x8xf32>
    %12 = vector.extract_strided_slice %1 {offsets = [0, 1, 0], sizes = [8, 1, 8], strides = [1, 1, 1]} : vector<8x3x8xf32> to vector<8x1x8xf32>
    %13 = vector.extract_strided_slice %3 {offsets = [1, 0, 0], sizes = [1, 16, 8], strides = [1, 1, 1]} : vector<3x16x8xf32> to vector<1x16x8xf32>
    %14 = vector.shape_cast %13 : vector<1x16x8xf32> to vector<16x8xf32>
    %15 = vector.shape_cast %14 : vector<16x8xf32> to vector<1x16x8xf32>
    %16 = vector.broadcast %12 : vector<8x1x8xf32> to vector<8x16x8xf32>
    %17 = vector.broadcast %15 : vector<1x16x8xf32> to vector<8x16x8xf32>
    %18 = arith.subf %16, %17 : vector<8x16x8xf32>
    %19 = arith.mulf %18, %18 : vector<8x16x8xf32>
    %20 = arith.addf %11, %19 : vector<8x16x8xf32>
    %21 = vector.extract_strided_slice %1 {offsets = [0, 2, 0], sizes = [8, 1, 8], strides = [1, 1, 1]} : vector<8x3x8xf32> to vector<8x1x8xf32>
    %22 = vector.extract_strided_slice %3 {offsets = [2, 0, 0], sizes = [1, 16, 8], strides = [1, 1, 1]} : vector<3x16x8xf32> to vector<1x16x8xf32>
    %23 = vector.shape_cast %22 : vector<1x16x8xf32> to vector<16x8xf32>
    %24 = vector.shape_cast %23 : vector<16x8xf32> to vector<1x16x8xf32>
    %25 = vector.broadcast %21 : vector<8x1x8xf32> to vector<8x16x8xf32>
    %26 = vector.broadcast %24 : vector<1x16x8xf32> to vector<8x16x8xf32>
    %27 = arith.subf %25, %26 : vector<8x16x8xf32>
    %28 = arith.mulf %27, %27 : vector<8x16x8xf32>
    %29 = arith.addf %20, %28 : vector<8x16x8xf32>
    %cst = arith.constant dense<0x7F800000> : vector<8x8xf32>
    %30 = vector.multi_reduction <minimumf>, %29, %cst [1] : vector<8x16x8xf32> to vector<8x8xf32>
    %31 = vector.shape_cast %30 : vector<8x8xf32> to vector<8x1x8xf32>
    %32 = tpu.iota {dimensions = array<i32: 1>} : vector<1x16x8xi32>
    %33 = vector.broadcast %31 : vector<8x1x8xf32> to vector<8x16x8xf32>
    %34 = arith.cmpf oeq, %29, %33 : vector<8x16x8xf32>
    %c16_i32 = arith.constant 16 : i32
    %35 = vector.shape_cast %32 : vector<1x16x8xi32> to vector<1x16x8xi32>
    %36 = vector.broadcast %35 : vector<1x16x8xi32> to vector<8x16x8xi32>
    %37 = vector.broadcast %c16_i32 : i32 to vector<8x16x8xi32>
    %38 = arith.select %34, %36, %37 : vector<8x16x8xi1>, vector<8x16x8xi32>
    %cst_7 = arith.constant dense<2147483647> : vector<8x8xi32>
    %39 = vector.multi_reduction <minsi>, %38, %cst_7 [1] : vector<8x16x8xi32> to vector<8x8xi32>
    %40 = vector.shape_cast %39 : vector<8x8xi32> to vector<8x1x8xi32>
    %41 = vector.broadcast %32 : vector<1x16x8xi32> to vector<8x16x8xi32>
    %42 = vector.broadcast %40 : vector<8x1x8xi32> to vector<8x16x8xi32>
    %43 = arith.cmpi eq, %41, %42 : vector<8x16x8xi32>
    %44 = vector.extract_strided_slice %3 {offsets = [0, 0, 0], sizes = [1, 16, 8], strides = [1, 1, 1]} : vector<3x16x8xf32> to vector<1x16x8xf32>
    %45 = vector.shape_cast %44 : vector<1x16x8xf32> to vector<16x8xf32>
    %46 = vector.shape_cast %45 : vector<16x8xf32> to vector<1x16x8xf32>
    %cst_8 = arith.constant 0.000000e+00 : f32
    %47 = vector.shape_cast %46 : vector<1x16x8xf32> to vector<1x16x8xf32>
    %48 = vector.broadcast %47 : vector<1x16x8xf32> to vector<8x16x8xf32>
    %49 = vector.broadcast %cst_8 : f32 to vector<8x16x8xf32>
    %50 = arith.select %43, %48, %49 : vector<8x16x8xi1>, vector<8x16x8xf32>
    %cst_9 = arith.constant dense<0.000000e+00> : vector<8x8xf32>
    %51 = vector.multi_reduction <add>, %50, %cst_9 [1] : vector<8x16x8xf32> to vector<8x8xf32>
    %52 = vector.shape_cast %51 : vector<8x8xf32> to vector<8x1x8xf32>
    %53 = vector.extract_strided_slice %1 {offsets = [0, 0, 0], sizes = [8, 1, 8], strides = [1, 1, 1]} : vector<8x3x8xf32> to vector<8x1x8xf32>
    %54 = arith.subf %53, %52 : vector<8x1x8xf32>
    %55 = math.absf %54 : vector<8x1x8xf32>
    %cst_10 = arith.constant 1.000000e+00 : f32
    %56 = vector.broadcast %cst_10 : f32 to vector<8x1x8xf32>
    %57 = arith.cmpf olt, %55, %56 : vector<8x1x8xf32>
    %cst_11 = arith.constant 5.000000e-01 : f32
    %58 = vector.broadcast %cst_11 : f32 to vector<8x1x8xf32>
    %59 = arith.mulf %58, %54 : vector<8x1x8xf32>
    %60 = arith.mulf %59, %54 : vector<8x1x8xf32>
    %cst_12 = arith.constant 5.000000e-01 : f32
    %61 = vector.broadcast %cst_12 : f32 to vector<8x1x8xf32>
    %62 = arith.subf %55, %61 : vector<8x1x8xf32>
    %63 = arith.select %57, %60, %62 : vector<8x1x8xi1>, vector<8x1x8xf32>
    %64 = vector.extract_strided_slice %3 {offsets = [1, 0, 0], sizes = [1, 16, 8], strides = [1, 1, 1]} : vector<3x16x8xf32> to vector<1x16x8xf32>
    %65 = vector.shape_cast %64 : vector<1x16x8xf32> to vector<16x8xf32>
    %66 = vector.shape_cast %65 : vector<16x8xf32> to vector<1x16x8xf32>
    %cst_13 = arith.constant 0.000000e+00 : f32
    %67 = vector.shape_cast %66 : vector<1x16x8xf32> to vector<1x16x8xf32>
    %68 = vector.broadcast %67 : vector<1x16x8xf32> to vector<8x16x8xf32>
    %69 = vector.broadcast %cst_13 : f32 to vector<8x16x8xf32>
    %70 = arith.select %43, %68, %69 : vector<8x16x8xi1>, vector<8x16x8xf32>
    %cst_14 = arith.constant dense<0.000000e+00> : vector<8x8xf32>
    %71 = vector.multi_reduction <add>, %70, %cst_14 [1] : vector<8x16x8xf32> to vector<8x8xf32>
    %72 = vector.shape_cast %71 : vector<8x8xf32> to vector<8x1x8xf32>
    %73 = vector.extract_strided_slice %1 {offsets = [0, 1, 0], sizes = [8, 1, 8], strides = [1, 1, 1]} : vector<8x3x8xf32> to vector<8x1x8xf32>
    %74 = arith.subf %73, %72 : vector<8x1x8xf32>
    %75 = math.absf %74 : vector<8x1x8xf32>
    %cst_15 = arith.constant 1.000000e+00 : f32
    %76 = vector.broadcast %cst_15 : f32 to vector<8x1x8xf32>
    %77 = arith.cmpf olt, %75, %76 : vector<8x1x8xf32>
    %cst_16 = arith.constant 5.000000e-01 : f32
    %78 = vector.broadcast %cst_16 : f32 to vector<8x1x8xf32>
    %79 = arith.mulf %78, %74 : vector<8x1x8xf32>
    %80 = arith.mulf %79, %74 : vector<8x1x8xf32>
    %cst_17 = arith.constant 5.000000e-01 : f32
    %81 = vector.broadcast %cst_17 : f32 to vector<8x1x8xf32>
    %82 = arith.subf %75, %81 : vector<8x1x8xf32>
    %83 = arith.select %77, %80, %82 : vector<8x1x8xi1>, vector<8x1x8xf32>
    %84 = arith.addf %63, %83 : vector<8x1x8xf32>
    %85 = vector.extract_strided_slice %3 {offsets = [2, 0, 0], sizes = [1, 16, 8], strides = [1, 1, 1]} : vector<3x16x8xf32> to vector<1x16x8xf32>
    %86 = vector.shape_cast %85 : vector<1x16x8xf32> to vector<16x8xf32>
    %87 = vector.shape_cast %86 : vector<16x8xf32> to vector<1x16x8xf32>
    %cst_18 = arith.constant 0.000000e+00 : f32
    %88 = vector.shape_cast %87 : vector<1x16x8xf32> to vector<1x16x8xf32>
    %89 = vector.broadcast %88 : vector<1x16x8xf32> to vector<8x16x8xf32>
    %90 = vector.broadcast %cst_18 : f32 to vector<8x16x8xf32>
    %91 = arith.select %43, %89, %90 : vector<8x16x8xi1>, vector<8x16x8xf32>
    %cst_19 = arith.constant dense<0.000000e+00> : vector<8x8xf32>
    %92 = vector.multi_reduction <add>, %91, %cst_19 [1] : vector<8x16x8xf32> to vector<8x8xf32>
    %93 = vector.shape_cast %92 : vector<8x8xf32> to vector<8x1x8xf32>
    %94 = vector.extract_strided_slice %1 {offsets = [0, 2, 0], sizes = [8, 1, 8], strides = [1, 1, 1]} : vector<8x3x8xf32> to vector<8x1x8xf32>
    %95 = arith.subf %94, %93 : vector<8x1x8xf32>
    %96 = math.absf %95 : vector<8x1x8xf32>
    %cst_20 = arith.constant 1.000000e+00 : f32
    %97 = vector.broadcast %cst_20 : f32 to vector<8x1x8xf32>
    %98 = arith.cmpf olt, %96, %97 : vector<8x1x8xf32>
    %cst_21 = arith.constant 5.000000e-01 : f32
    %99 = vector.broadcast %cst_21 : f32 to vector<8x1x8xf32>
    %100 = arith.mulf %99, %95 : vector<8x1x8xf32>
    %101 = arith.mulf %100, %95 : vector<8x1x8xf32>
    %cst_22 = arith.constant 5.000000e-01 : f32
    %102 = vector.broadcast %cst_22 : f32 to vector<8x1x8xf32>
    %103 = arith.subf %96, %102 : vector<8x1x8xf32>
    %104 = arith.select %98, %101, %103 : vector<8x1x8xi1>, vector<8x1x8xf32>
    %105 = arith.addf %84, %104 : vector<8x1x8xf32>
    %cst_23 = arith.constant dense<0.000000e+00> : vector<8x8xf32>
    %106 = vector.multi_reduction <add>, %105, %cst_23 [1] : vector<8x1x8xf32> to vector<8x8xf32>
    %cst_24 = arith.constant dense<0.000000e+00> : vector<8xf32>
    %107 = vector.multi_reduction <add>, %106, %cst_24 [0] : vector<8x8xf32> to vector<8xf32>
    %cst_25 = arith.constant 0.0416666679 : f32
    %108 = vector.broadcast %cst_25 : f32 to vector<8xf32>
    %109 = arith.mulf %107, %108 : vector<8xf32>
    %110 = vector.shape_cast %109 : vector<8xf32> to vector<1x8xf32>
    %c0_26 = arith.constant 0 : index
    %c0_27 = arith.constant 0 : index
    %111 = vector.load %arg3[%c0_26, %c0_27] : memref<1x8xf32, #tpu.memory_space<vmem>>, vector<1x8xf32>
    tpu.vector_store %arg3[%c0_26, %c0_27], %110 {strides = array<i32>} : memref<1x8xf32, #tpu.memory_space<vmem>>, vector<1x8xf32>,
    %cst_28 = arith.constant dense<0.000000e+00> : vector<3x8xf32>
    %112 = vector.multi_reduction <add>, %1, %cst_28 [0] : vector<8x3x8xf32> to vector<3x8xf32>
    %cst_29 = arith.constant 8.000000e+00 : f32
    %113 = vector.broadcast %cst_29 : f32 to vector<3x8xf32>
    %114 = arith.divf %112, %113 : vector<3x8xf32>
    %cst_30 = arith.constant dense<0.000000e+00> : vector<3x8xf32>
    %115 = vector.multi_reduction <add>, %3, %cst_30 [1] : vector<3x16x8xf32> to vector<3x8xf32>
    %cst_31 = arith.constant 1.600000e+01 : f32
    %116 = vector.broadcast %cst_31 : f32 to vector<3x8xf32>
    %117 = arith.divf %115, %116 : vector<3x8xf32>
    %118 = arith.subf %114, %117 : vector<3x8xf32>
    %119 = math.absf %118 : vector<3x8xf32>
    %cst_32 = arith.constant 1.000000e+00 : f32
    %120 = vector.broadcast %cst_32 : f32 to vector<3x8xf32>
    %121 = arith.cmpf olt, %119, %120 : vector<3x8xf32>
    %cst_33 = arith.constant 5.000000e-01 : f32
    %122 = vector.broadcast %cst_33 : f32 to vector<3x8xf32>
    %123 = arith.mulf %122, %118 : vector<3x8xf32>
    %124 = arith.mulf %123, %118 : vector<3x8xf32>
    %cst_34 = arith.constant 5.000000e-01 : f32
    %125 = vector.broadcast %cst_34 : f32 to vector<3x8xf32>
    %126 = arith.subf %119, %125 : vector<3x8xf32>
    %127 = arith.select %121, %124, %126 : vector<3x8xi1>, vector<3x8xf32>
    %cst_35 = arith.constant dense<0.000000e+00> : vector<8xf32>
    %128 = vector.multi_reduction <add>, %127, %cst_35 [0] : vector<3x8xf32> to vector<8xf32>
    %129 = vector.shape_cast %128 : vector<8xf32> to vector<1x8xf32>
    %c0_36 = arith.constant 0 : index
    %c0_37 = arith.constant 0 : index
    %130 = vector.load %arg4[%c0_36, %c0_37] : memref<1x8xf32, #tpu.memory_space<vmem>>, vector<1x8xf32>
    tpu.vector_store %arg4[%c0_36, %c0_37], %129 {strides = array<i32>} : memref<1x8xf32, #tpu.memory_space<vmem>>, vector<1x8xf32>,
    return
  }
  func.func @transform_0(%arg0: i32) -> (i32, i32, i32, i32) {
    %c0_i32 = arith.constant 0 : i32
    %c0_i32_0 = arith.constant 0 : i32
    %c0_i32_1 = arith.constant 0 : i32
    %c0_i32_2 = arith.constant 0 : i32
    return %arg0, %c0_i32, %c0_i32_0, %c0_i32_1 : i32, i32, i32, i32
  }
  func.func @transform_1(%arg0: i32) -> (i32, i32, i32, i32) {
    %c0_i32 = arith.constant 0 : i32
    %c0_i32_0 = arith.constant 0 : i32
    %c0_i32_1 = arith.constant 0 : i32
    %c0_i32_2 = arith.constant 0 : i32
    return %arg0, %c0_i32, %c0_i32_0, %c0_i32_1 : i32, i32, i32, i32
  }
  func.func @transform_2(%arg0: i32) -> (i32, i32) {
    %c0_i32 = arith.constant 0 : i32
    %c0_i32_0 = arith.constant 0 : i32
    return %arg0, %c0_i32 : i32, i32
  }
  func.func @transform_3(%arg0: i32) -> (i32, i32) {
    %c0_i32 = arith.constant 0 : i32
    %c0_i32_0 = arith.constant 0 : i32
    return %arg0, %c0_i32 : i32, i32
  }
}

</mosaic_0001>

<bundles_post_ra>
// kernel: geometric_reconstruction_loss.1
= control target key start
LH: loop header
LB: loop body
LE: loop exit
PB: predicated region body
PF: predicated region fallthrough
CT: control target
= control target key end

     0   :  { %v27_v0 = vlaneseq  ;;  %vm2124_vm0 = vcmask 64512   ;;  %s2113_s0 = inlined_call_operand.vmem [shape: f32[1,8,3,8], index: 0, kind: input, shape index: {}]   ;;  %s2114_s1 = inlined_call_operand.vmem [shape: f32[1,3,16,8], index: 1, kind: input, shape index: {}]   ;;  %s2115_s2 = inlined_call_operand.vmem [shape: f32[1,8], index: 2, kind: output, shape index: {0}]   ;;  %s2116_s3 = inlined_call_operand.vmem [shape: f32[1,8], index: 3, kind: output, shape index: {1}]  }
   0x1   :  { %v1163_v1 = vld [vmem:[%s2113_s0] sm:$0x7]  ;;  %v1168_v2 = vld [vmem:[%s2113_s0 + $0x4] sm:$0x7]  ;;  %v1173_v3 = vld [vmem:[%s2113_s0 + $0x8] sm:$0x7] }
   0x2   :  { %v1175_v4 = vshrl.u32 %v27_v0, 7  ;;  %v1180_v5 = vld [vmem:[%s2113_s0 + $0xc] sm:$0x7]  ;;  %v1185_v6 = vld [vmem:[%s2113_s0 + $0x10] sm:$0x7]  ;;  %v1206_v11 = vld [vmem:[%s2114_s1] sm:$0xff] }
   0x3   :  { %v1190_v7 = vld [vmem:[%s2113_s0 + $0x14] sm:$0x7]  ;;  %v1195_v8 = vld [vmem:[%s2113_s0 + $0x18] sm:$0x7]  ;;  %v1200_v9 = vld [vmem:[%s2113_s0 + $0x1c] sm:$0x7] }
   0x4   :  { %2176 = vst [vmem:[#allocation2_spill] sm:$0xff] %v1175_v4  ;;  %v29_v10 = vsub.s32 0, %v1175_v4  ;;  %2177 = vst [vmem:[#allocation3_spill] sm:$0xff] %v1206_v11  ;;  %v1211_v12 = vld [vmem:[%s2114_s1 + $0x8] sm:$0xff]  ;;  %v93_v13 = vsub.s32 1, %v1175_v4  ;;  %v1215_v14 = vsub.s32 2, %v1175_v4 }
   0x5   :  { %2178 = vst [vmem:[#allocation4_spill] sm:$0xff] %v1211_v12  ;;  %v1218_v15 = vadd.s32 8, %v1175_v4  ;;  %v1247_v52 = vld [vmem:[%s2114_s1 + $0x10] sm:$0xff]  ;;  %v1252_v53 = vld [vmem:[%s2114_s1 + $0x18] sm:$0xff] }
   0x6   :  { %v30_v16 = vrot.slane %v1163_v1, %v29_v10  ;;  %v34_v17 = vrot.slane %v1168_v2, %v29_v10  ;;  %v38_v18 = vrot.slane %v1173_v3, %v29_v10  ;;  %v42_v19 = vrot.slane %v1180_v5, %v29_v10  ;;  %2180 = vst [vmem:[#allocation6_spill] sm:$0xff] %v1247_v52 }
   0x7   :  { %2179 = vst [vmem:[#allocation5_spill] sm:$0xff] %v1218_v15  ;;  %v46_v20 = vrot.slane %v1185_v6, %v29_v10  ;;  %v50_v21 = vrot.slane %v1190_v7, %v29_v10  ;;  %v54_v22 = vrot.slane %v1195_v8, %v29_v10  ;;  %v58_v23 = vrot.slane %v1200_v9, %v29_v10 }
   0x8   :  { %v59_v24 = vsub.f32 %v30_v16, %v1206_v11  ;;  %v60_v25 = vsub.f32 %v30_v16, %v1211_v12  ;;  %v61_v26 = vsub.f32 %v34_v17, %v1206_v11  ;;  %v62_v27 = vsub.f32 %v34_v17, %v1211_v12 }
   0x9   :  { %v63_v28 = vsub.f32 %v38_v18, %v1206_v11  ;;  %v64_v29 = vsub.f32 %v38_v18, %v1211_v12  ;;  %v65_v30 = vsub.f32 %v42_v19, %v1206_v11  ;;  %v66_v31 = vsub.f32 %v42_v19, %v1211_v12 }
   0xa   :  { %v67_v32 = vsub.f32 %v46_v20, %v1206_v11  ;;  %v68_v33 = vsub.f32 %v46_v20, %v1211_v12  ;;  %v69_v34 = vsub.f32 %v50_v21, %v1206_v11  ;;  %v70_v35 = vsub.f32 %v50_v21, %v1211_v12 }
   0xb   :  { %v71_v36 = vsub.f32 %v54_v22, %v1206_v11  ;;  %v72_v37 = vsub.f32 %v54_v22, %v1211_v12  ;;  %v73_v38 = vsub.f32 %v58_v23, %v1206_v11  ;;  %v74_v39 = vsub.f32 %v58_v23, %v1211_v12 }
   0xc   :  { %v75_v40 = vmul.f32 %v59_v24, %v59_v24  ;;  %v76_v41 = vmul.f32 %v60_v25, %v60_v25  ;;  %v77_v42 = vmul.f32 %v61_v26, %v61_v26  ;;  %v78_v43 = vmul.f32 %v62_v27, %v62_v27 }
   0xd   :  { %v79_v44 = vmul.f32 %v63_v28, %v63_v28  ;;  %v80_v45 = vmul.f32 %v64_v29, %v64_v29  ;;  %v81_v46 = vmul.f32 %v65_v30, %v65_v30  ;;  %v82_v47 = vmul.f32 %v66_v31, %v66_v31 }
   0xe   :  { %v83_v48 = vmul.f32 %v67_v32, %v67_v32  ;;  %v84_v49 = vmul.f32 %v68_v33, %v68_v33  ;;  %v85_v50 = vmul.f32 %v69_v34, %v69_v34  ;;  %v86_v51 = vmul.f32 %v70_v35, %v70_v35 }
   0xf   :  { %v87_v54 = vmul.f32 %v71_v36, %v71_v36  ;;  %v88_v55 = vmul.f32 %v72_v37, %v72_v37  ;;  %v89_v56 = vmul.f32 %v73_v38, %v73_v38  ;;  %v90_v57 = vmul.f32 %v74_v39, %v74_v39 }
  0x10   :  { %v94_v58 = vrot.slane %v1163_v1, %v93_v13  ;;  %v98_v59 = vrot.slane %v1168_v2, %v93_v13  ;;  %v102_v60 = vrot.slane %v1173_v3, %v93_v13  ;;  %v106_v61 = vrot.slane %v1180_v5, %v93_v13 }
  0x11   :  { %v110_v62 = vrot.slane %v1185_v6, %v93_v13  ;;  %v114_v63 = vrot.slane %v1190_v7, %v93_v13  ;;  %v118_v0 = vrot.slane %v1195_v8, %v93_v13  ;;  %v122_v10 = vrot.slane %v1200_v9, %v93_v13 }
  0x12   :  { %v123_v16 = vsub.f32 %v94_v58, %v1247_v52  ;;  %v124_v17 = vsub.f32 %v94_v58, %v1252_v53  ;;  %v125_v18 = vsub.f32 %v98_v59, %v1247_v52  ;;  %v126_v19 = vsub.f32 %v98_v59, %v1252_v53 }
  0x13   :  { %v127_v20 = vsub.f32 %v102_v60, %v1247_v52  ;;  %v128_v21 = vsub.f32 %v102_v60, %v1252_v53  ;;  %v129_v22 = vsub.f32 %v106_v61, %v1247_v52  ;;  %v130_v23 = vsub.f32 %v106_v61, %v1252_v53 }
  0x14   :  { %v131_v24 = vsub.f32 %v110_v62, %v1247_v52  ;;  %v132_v13 = vsub.f32 %v110_v62, %v1252_v53  ;;  %v133_v25 = vsub.f32 %v114_v63, %v1247_v52  ;;  %v134_v26 = vsub.f32 %v114_v63, %v1252_v53 }
  0x15   :  { %v135_v27 = vsub.f32 %v118_v0, %v1247_v52  ;;  %v136_v28 = vsub.f32 %v118_v0, %v1252_v53  ;;  %v137_v29 = vsub.f32 %v122_v10, %v1247_v52  ;;  %v138_v30 = vsub.f32 %v122_v10, %v1252_v53 }
  0x16   :  { %v139_v31 = vmul.f32 %v123_v16, %v123_v16  ;;  %v140_v32 = vmul.f32 %v124_v17, %v124_v17  ;;  %v141_v33 = vmul.f32 %v125_v18, %v125_v18  ;;  %v142_v34 = vmul.f32 %v126_v19, %v126_v19 }
  0x17   :  { %v143_v35 = vmul.f32 %v127_v20, %v127_v20  ;;  %v144_v36 = vmul.f32 %v128_v21, %v128_v21  ;;  %v145_v37 = vmul.f32 %v129_v22, %v129_v22  ;;  %v146_v38 = vmul.f32 %v130_v23, %v130_v23 }
  0x18   :  { %v147_v39 = vmul.f32 %v131_v24, %v131_v24  ;;  %v148_v58 = vmul.f32 %v132_v13, %v132_v13  ;;  %v149_v59 = vmul.f32 %v133_v25, %v133_v25  ;;  %v150_v60 = vmul.f32 %v134_v26, %v134_v26  ;;  %v25_v24 = vld [vmem:[%s2114_s1 + $0x20] sm:$0xff]  ;;  %v26_v13 = vld [vmem:[%s2114_s1 + $0x28] sm:$0xff] }
  0x19   :  { %v151_v61 = vmul.f32 %v135_v27, %v135_v27  ;;  %v152_v62 = vmul.f32 %v136_v28, %v136_v28  ;;  %v153_v63 = vmul.f32 %v137_v29, %v137_v29  ;;  %v154_v0 = vmul.f32 %v138_v30, %v138_v30 }
  0x1a   :  { %v155_v12 = vadd.f32 %v139_v31, %v75_v40  ;;  %v156_v52 = vadd.f32 %v140_v32, %v76_v41  ;;  %v157_v11 = vadd.f32 %v141_v33, %v77_v42  ;;  %v158_v10 = vadd.f32 %v142_v34, %v78_v43 }
  0x1b   :  { %v159_v16 = vadd.f32 %v143_v35, %v79_v44  ;;  %v160_v17 = vadd.f32 %v144_v36, %v80_v45  ;;  %v161_v18 = vadd.f32 %v145_v37, %v81_v46  ;;  %v162_v19 = vadd.f32 %v146_v38, %v82_v47 }
  0x1c   :  { %v163_v20 = vadd.f32 %v147_v39, %v83_v48  ;;  %v164_v21 = vadd.f32 %v148_v58, %v84_v49  ;;  %v165_v22 = vadd.f32 %v149_v59, %v85_v50  ;;  %v166_v23 = vadd.f32 %v150_v60, %v86_v51 }
  0x1d   :  { %v167_v40 = vadd.f32 %v151_v61, %v87_v54  ;;  %v168_v41 = vadd.f32 %v152_v62, %v88_v55  ;;  %v169_v42 = vadd.f32 %v153_v63, %v89_v56  ;;  %v170_v43 = vadd.f32 %v154_v0, %v90_v57 }
  0x1e   :  { %v174_v44 = vrot.slane %v1163_v1, %v1215_v14  ;;  %v178_v45 = vrot.slane %v1168_v2, %v1215_v14  ;;  %v182_v46 = vrot.slane %v1173_v3, %v1215_v14  ;;  %v186_v47 = vrot.slane %v1180_v5, %v1215_v14 }
  0x1f   :  { %v190_v48 = vrot.slane %v1185_v6, %v1215_v14  ;;  %v194_v49 = vrot.slane %v1190_v7, %v1215_v14  ;;  %v198_v50 = vrot.slane %v1195_v8, %v1215_v14  ;;  %v202_v51 = vrot.slane %v1200_v9, %v1215_v14 }
  0x20   :  { %v203_v54 = vsub.f32 %v174_v44, %v25_v24  ;;  %v204_v55 = vsub.f32 %v174_v44, %v26_v13  ;;  %v205_v56 = vsub.f32 %v178_v45, %v25_v24  ;;  %v206_v57 = vsub.f32 %v178_v45, %v26_v13 }
  0x21   :  { %v207_v25 = vsub.f32 %v182_v46, %v25_v24  ;;  %v208_v26 = vsub.f32 %v182_v46, %v26_v13  ;;  %v209_v27 = vsub.f32 %v186_v47, %v25_v24  ;;  %v210_v28 = vsub.f32 %v186_v47, %v26_v13 }
  0x22   :  { %v211_v29 = vsub.f32 %v190_v48, %v25_v24  ;;  %v212_v30 = vsub.f32 %v190_v48, %v26_v13  ;;  %v213_v31 = vsub.f32 %v194_v49, %v25_v24  ;;  %v214_v32 = vsub.f32 %v194_v49, %v26_v13 }
  0x23   :  { %v215_v33 = vsub.f32 %v198_v50, %v25_v24  ;;  %v216_v34 = vsub.f32 %v198_v50, %v26_v13  ;;  %v217_v35 = vsub.f32 %v202_v51, %v25_v24  ;;  %v218_v36 = vsub.f32 %v202_v51, %v26_v13 }
  0x24   :  { %v219_v37 = vmul.f32 %v203_v54, %v203_v54  ;;  %v220_v38 = vmul.f32 %v204_v55, %v204_v55  ;;  %v221_v14 = vmul.f32 %v205_v56, %v205_v56  ;;  %v222_v39 = vmul.f32 %v206_v57, %v206_v57 }
  0x25   :  { %v223_v58 = vmul.f32 %v207_v25, %v207_v25  ;;  %v224_v59 = vmul.f32 %v208_v26, %v208_v26  ;;  %v225_v60 = vmul.f32 %v209_v27, %v209_v27  ;;  %v226_v61 = vmul.f32 %v210_v28, %v210_v28 }
  0x26   :  { %v227_v62 = vmul.f32 %v211_v29, %v211_v29  ;;  %v228_v63 = vmul.f32 %v212_v30, %v212_v30  ;;  %v229_v0 = vmul.f32 %v213_v31, %v213_v31  ;;  %v230_v44 = vmul.f32 %v214_v32, %v214_v32 }
  0x27   :  { %v231_v45 = vmul.f32 %v215_v33, %v215_v33  ;;  %v232_v46 = vmul.f32 %v216_v34, %v216_v34  ;;  %v233_v47 = vmul.f32 %v217_v35, %v217_v35  ;;  %v234_v48 = vmul.f32 %v218_v36, %v218_v36 }
  0x28   :  { %v1300_v49 = vadd.f32 %v219_v37, %v155_v12  ;;  %v1302_v24 = vadd.f32 %v220_v38, %v156_v52  ;;  %v1304_v13 = vadd.f32 %v221_v14, %v157_v11  ;;  %v1306_v50 = vadd.f32 %v222_v39, %v158_v10 }
  0x29   :  { %v1308_v51 = vadd.f32 %v223_v58, %v159_v16  ;;  %v1310_v54 = vadd.f32 %v224_v59, %v160_v17  ;;  %v1312_v55 = vadd.f32 %v225_v60, %v161_v18  ;;  %v1314_v56 = vadd.f32 %v226_v61, %v162_v19 }
  0x2a   :  { %v1316_v57 = vadd.f32 %v227_v62, %v163_v20  ;;  %v1318_v25 = vadd.f32 %v228_v63, %v164_v21  ;;  %v1320_v12 = vadd.f32 %v229_v0, %v165_v22  ;;  %v1322_v52 = vadd.f32 %v230_v44, %v166_v23 }
  0x2b   :  { %v1324_v11 = vadd.f32 %v231_v45, %v167_v40  ;;  %v1326_v10 = vadd.f32 %v232_v46, %v168_v41  ;;  %v1328_v16 = vadd.f32 %v233_v47, %v169_v42  ;;  %v1330_v17 = vadd.f32 %v234_v48, %v170_v43 }
  0x2c   :  { %v252_v18 = vsel %vm2124_vm0, %v1300_v49, inf  ;;  %v253_v19 = vsel %vm2124_vm0, %v1302_v24, inf  ;;  %v261_v20 = vsel %vm2124_vm0, %v1304_v13, inf  ;;  %v262_v21 = vsel %vm2124_vm0, %v1306_v50, inf }
  0x2d   :  { %v254_v22 = vmin.f32 %v252_v18, %v253_v19  ;;  %v263_v23 = vmin.f32 %v261_v20, %v262_v21  ;;  %v270_v40 = vsel %vm2124_vm0, %v1308_v51, inf  ;;  %v271_v41 = vsel %vm2124_vm0, %v1310_v54, inf }
  0x2e   :  { %v272_v42 = vmin.f32 %v270_v40, %v271_v41  ;;  %v279_v43 = vsel %vm2124_vm0, %v1312_v55, inf  ;;  %v280_v26 = vsel %vm2124_vm0, %v1314_v56, inf  ;;  %v288_v27 = vsel %vm2124_vm0, %v1316_v57, inf }
  0x2f   :  { %v255_v28 = vrot.slane %v254_v22, 4  ;;  %v264_v29 = vrot.slane %v263_v23, 4  ;;  %v281_v30 = vmin.f32 %v279_v43, %v280_v26  ;;  %v289_v31 = vsel %vm2124_vm0, %v1318_v25, inf }
  0x30   :  { %v273_v32 = vrot.slane %v272_v42, 4  ;;  %v290_v33 = vmin.f32 %v288_v27, %v289_v31  ;;  %v297_v34 = vsel %vm2124_vm0, %v1320_v12, inf  ;;  %v298_v35 = vsel %vm2124_vm0, %v1322_v52, inf }
  0x31   :  { %v256_v36 = vmin.f32 %v254_v22, %v255_v28  ;;  %v265_v37 = vmin.f32 %v263_v23, %v264_v29  ;;  %v282_v38 = vrot.slane %v281_v30, 4  ;;  %v299_v14 = vmin.f32 %v297_v34, %v298_v35 }
  0x32   :  { %v274_v39 = vmin.f32 %v272_v42, %v273_v32  ;;  %v291_v58 = vrot.slane %v290_v33, 4  ;;  %v306_v59 = vsel %vm2124_vm0, %v1324_v11, inf  ;;  %v307_v60 = vsel %vm2124_vm0, %v1326_v10, inf }
  0x33   :  { %v257_v61 = vrot.slane %v256_v36, 2  ;;  %v266_v62 = vrot.slane %v265_v37, 2  ;;  %v283_v63 = vmin.f32 %v281_v30, %v282_v38  ;;  %v300_v0 = vrot.slane %v299_v14, 4 }
  0x34   :  { %v275_v44 = vrot.slane %v274_v39, 2  ;;  %v292_v45 = vmin.f32 %v290_v33, %v291_v58  ;;  %v308_v46 = vmin.f32 %v306_v59, %v307_v60  ;;  %v315_v47 = vsel %vm2124_vm0, %v1328_v16, inf }
  0x35   :  { %v258_v48 = vmin.f32 %v256_v36, %v257_v61  ;;  %v267_v18 = vmin.f32 %v265_v37, %v266_v62  ;;  %v284_v19 = vrot.slane %v283_v63, 2  ;;  %v301_v20 = vmin.f32 %v299_v14, %v300_v0 }
  0x36   :  { %v276_v21 = vmin.f32 %v274_v39, %v275_v44  ;;  %v293_v22 = vrot.slane %v292_v45, 2  ;;  %v309_v23 = vrot.slane %v308_v46, 4  ;;  %v316_v40 = vsel %vm2124_vm0, %v1330_v17, inf }
  0x37   :  { %v259_v41 = vrot.slane %v258_v48, 1  ;;  %v268_v42 = vrot.slane %v267_v18, 1  ;;  %v285_v43 = vmin.f32 %v283_v63, %v284_v19  ;;  %v302_v26 = vrot.slane %v301_v20, 2 }
  0x38   :  { %v277_v27 = vrot.slane %v276_v21, 1  ;;  %v294_v28 = vmin.f32 %v292_v45, %v293_v22  ;;  %v310_v29 = vmin.f32 %v308_v46, %v309_v23  ;;  %v317_v30 = vmin.f32 %v315_v47, %v316_v40 }
  0x39   :  { %v260_v31 = vmin.f32 %v258_v48, %v259_v41  ;;  %v269_v32 = vmin.f32 %v267_v18, %v268_v42  ;;  %v286_v33 = vrot.slane %v285_v43, 1  ;;  %v303_v34 = vmin.f32 %v301_v20, %v302_v26 }
  0x3a   :  { %v278_v35 = vmin.f32 %v276_v21, %v277_v27  ;;  %v295_v36 = vrot.slane %v294_v28, 1  ;;  %v311_v37 = vrot.slane %v310_v29, 2  ;;  %v318_v38 = vrot.slane %v317_v30, 4 }
  0x3b   :  { %v287_v14 = vmin.f32 %v285_v43, %v286_v33  ;;  %v304_v39 = vrot.slane %v303_v34, 1  ;;  %vm327_vm1 = vcmp.eq.f32.partialorder %v1300_v49, %v260_v31  ;;  %vm328_vm2 = vcmp.eq.f32.partialorder %v1302_v24, %v260_v31 }
  0x3c   :  { %v296_v58 = vmin.f32 %v294_v28, %v295_v36  ;;  %v312_v59 = vmin.f32 %v310_v29, %v311_v37  ;;  %v319_v60 = vmin.f32 %v317_v30, %v318_v38  ;;  %vm329_vm3 = vcmp.eq.f32.partialorder %v1304_v13, %v269_v32 }
  0x3d   :  { %v305_v61 = vmin.f32 %v303_v34, %v304_v39  ;;  %vm330_vm4 = vcmp.eq.f32.partialorder %v1306_v50, %v269_v32  ;;  %vm331_vm5 = vcmp.eq.f32.partialorder %v1308_v51, %v278_v35  ;;  %vm332_vm6 = vcmp.eq.f32.partialorder %v1310_v54, %v278_v35 }
  0x3e   :  { %v313_v62 = vrot.slane %v312_v59, 1  ;;  %v320_v63 = vrot.slane %v319_v60, 2  ;;  %vm333_vm7 = vcmp.eq.f32.partialorder %v1312_v55, %v287_v14  ;;  %vm334_vm8 = vcmp.eq.f32.partialorder %v1314_v56, %v287_v14 }
  0x3f   :  { %vm335_vm9 = vcmp.eq.f32.partialorder %v1316_v57, %v296_v58  ;;  %vm336_vm10 = vcmp.eq.f32.partialorder %v1318_v25, %v296_v58  ;;  %vm337_vm11 = vcmp.eq.f32.partialorder %v1320_v12, %v305_v61  ;;  %vm338_vm12 = vcmp.eq.f32.partialorder %v1322_v52, %v305_v61 }
  0x40   :  { %v314_v0 = vmin.f32 %v312_v59, %v313_v62  ;;  %v321_v44 = vmin.f32 %v319_v60, %v320_v63  ;;  %v343_v45 = vsel %vm327_vm1, %v1175_v4, 16  ;;  %v344_v46 = vsel %vm328_vm2, %v1218_v15, 16 }
  0x41   :  { %v345_v47 = vsel %vm329_vm3, %v1175_v4, 16  ;;  %v346_v48 = vsel %vm330_vm4, %v1218_v15, 16  ;;  %v347_v18 = vsel %vm331_vm5, %v1175_v4, 16  ;;  %v348_v49 = vsel %vm332_vm6, %v1218_v15, 16 }
  0x42   :  { %v322_v19 = vrot.slane %v321_v44, 1  ;;  %vm339_vm13 = vcmp.eq.f32.partialorder %v1324_v11, %v314_v0  ;;  %vm340_vm14 = vcmp.eq.f32.partialorder %v1326_v10, %v314_v0  ;;  %v349_v24 = vsel %vm333_vm7, %v1175_v4, 16 }
  0x43   :  { %v350_v13 = vsel %vm334_vm8, %v1218_v15, 16  ;;  %v351_v50 = vsel %vm335_vm9, %v1175_v4, 16  ;;  %v352_v51 = vsel %vm336_vm10, %v1218_v15, 16  ;;  %v353_v54 = vsel %vm337_vm11, %v1175_v4, 16 }
  0x44   :  { %v323_v11 = vmin.f32 %v321_v44, %v322_v19  ;;  %v354_v55 = vsel %vm338_vm12, %v1218_v15, 16  ;;  %v355_v56 = vsel %vm339_vm13, %v1175_v4, 16  ;;  %v1416_v10 = vsel %vm340_vm14, %v1218_v15, 16 }
  0x45   :  { %v359_v57 = vsel %vm2124_vm0, %v343_v45, 2147483647  ;;  %v360_v20 = vsel %vm2124_vm0, %v344_v46, 2147483647  ;;  %v372_v25 = vsel %vm2124_vm0, %v345_v47, 2147483647 }
  0x46   :  { %vm341_vm15 = vcmp.eq.f32.partialorder %v1328_v16, %v323_v11  ;;  %vm342_vm1 = vcmp.eq.f32.partialorder %v1330_v17, %v323_v11  ;;  %vm361_vm2 = vcmp.lt.s32.totalorder %v359_v57, %v360_v20  ;;  %v373_v12 = vsel %vm2124_vm0, %v346_v48, 2147483647 }
  0x47   :  { %v1425_v52 = vsel %vm341_vm15, %v1175_v4, 16  ;;  %v1428_v21 = vsel %vm342_vm1, %v1218_v15, 16  ;;  %v362_v22 = vsel %vm361_vm2, %v359_v57, %v360_v20  ;;  %vm374_vm3 = vcmp.lt.s32.totalorder %v372_v25, %v373_v12 }
  0x48   :  { %v363_v23 = vrot.slane %v362_v22, 4  ;;  %v375_v40 = vsel %vm374_vm3, %v372_v25, %v373_v12  ;;  %v385_v41 = vsel %vm2124_vm0, %v347_v18, 2147483647  ;;  %v386_v42 = vsel %vm2124_vm0, %v348_v49, 2147483647 }
  0x49   :  { %v376_v16 = vrot.slane %v375_v40, 4  ;;  %vm387_vm4 = vcmp.lt.s32.totalorder %v385_v41, %v386_v42  ;;  %v398_v17 = vsel %vm2124_vm0, %v349_v24, 2147483647  ;;  %v399_v43 = vsel %vm2124_vm0, %v350_v13, 2147483647 }
  0x4a   :  { %vm364_vm5 = vcmp.lt.s32.totalorder %v362_v22, %v363_v23  ;;  %v388_v26 = vsel %vm387_vm4, %v385_v41, %v386_v42  ;;  %vm400_vm6 = vcmp.lt.s32.totalorder %v398_v17, %v399_v43  ;;  %v411_v27 = vsel %vm2124_vm0, %v351_v50, 2147483647 }
  0x4b   :  { %v365_v28 = vsel %vm364_vm5, %v362_v22, %v363_v23  ;;  %vm377_vm7 = vcmp.lt.s32.totalorder %v375_v40, %v376_v16  ;;  %v389_v29 = vrot.slane %v388_v26, 4  ;;  %v401_v30 = vsel %vm400_vm6, %v398_v17, %v399_v43 }
  0x4c   :  { %v366_v31 = vrot.slane %v365_v28, 2  ;;  %v378_v32 = vsel %vm377_vm7, %v375_v40, %v376_v16  ;;  %v402_v33 = vrot.slane %v401_v30, 4  ;;  %v412_v34 = vsel %vm2124_vm0, %v352_v51, 2147483647 }
  0x4d   :  { %v379_v35 = vrot.slane %v378_v32, 2  ;;  %vm390_vm8 = vcmp.lt.s32.totalorder %v388_v26, %v389_v29  ;;  %vm413_vm9 = vcmp.lt.s32.totalorder %v411_v27, %v412_v34  ;;  %v424_v36 = vsel %vm2124_vm0, %v353_v54, 2147483647 }
  0x4e   :  { %vm367_vm10 = vcmp.lt.s32.totalorder %v365_v28, %v366_v31  ;;  %v391_v37 = vsel %vm390_vm8, %v388_v26, %v389_v29  ;;  %vm403_vm11 = vcmp.lt.s32.totalorder %v401_v30, %v402_v33  ;;  %v414_v38 = vsel %vm413_vm9, %v411_v27, %v412_v34 }
  0x4f   :  { %v368_v14 = vsel %vm367_vm10, %v365_v28, %v366_v31  ;;  %vm380_vm12 = vcmp.lt.s32.totalorder %v378_v32, %v379_v35  ;;  %v392_v39 = vrot.slane %v391_v37, 2  ;;  %v404_v58 = vsel %vm403_vm11, %v401_v30, %v402_v33  ;;  %v2186_v28 = vld [vmem:[#allocation3_spill] sm:$0xff]  ;;  %v2188_v31 = vld [vmem:[#allocation4_spill] sm:$0xff] }
  0x50   :  { %v369_v59 = vrot.slane %v368_v14, 1  ;;  %v381_v60 = vsel %vm380_vm12, %v378_v32, %v379_v35  ;;  %v405_v61 = vrot.slane %v404_v58, 2  ;;  %v415_v62 = vrot.slane %v414_v38, 4 }
  0x51   :  { %v382_v63 = vrot.slane %v381_v60, 1  ;;  %vm393_vm13 = vcmp.lt.s32.totalorder %v391_v37, %v392_v39  ;;  %v425_v0 = vsel %vm2124_vm0, %v354_v55, 2147483647  ;;  %v437_v44 = vsel %vm2124_vm0, %v355_v56, 2147483647 }
  0x52   :  { %vm370_vm14 = vcmp.lt.s32.totalorder %v368_v14, %v369_v59  ;;  %v394_v45 = vsel %vm393_vm13, %v391_v37, %v392_v39  ;;  %vm406_vm15 = vcmp.lt.s32.totalorder %v404_v58, %v405_v61  ;;  %vm416_vm1 = vcmp.lt.s32.totalorder %v414_v38, %v415_v62 }
  0x53   :  { %v1439_v46 = vsel %vm370_vm14, %v368_v14, %v369_v59  ;;  %vm383_vm2 = vcmp.lt.s32.totalorder %v381_v60, %v382_v63  ;;  %v395_v47 = vrot.slane %v394_v45, 1  ;;  %v407_v48 = vsel %vm406_vm15, %v404_v58, %v405_v61 }
  0x54   :  { %2181 = vst [vmem:[#allocation7_spill] sm:$0xff] %v1439_v46  ;;  %v1441_v18 = vsel %vm383_vm2, %v381_v60, %v382_v63  ;;  %v408_v49 = vrot.slane %v407_v48, 1  ;;  %v417_v19 = vsel %vm416_vm1, %v414_v38, %v415_v62  ;;  %vm426_vm3 = vcmp.lt.s32.totalorder %v424_v36, %v425_v0 }
  0x55   :  { %2182 = vst [vmem:[#allocation8_spill] sm:$0xff] %v1441_v18  ;;  %vm396_vm4 = vcmp.lt.s32.totalorder %v394_v45, %v395_v47  ;;  %v418_v24 = vrot.slane %v417_v19, 2  ;;  %v427_v13 = vsel %vm426_vm3, %v424_v36, %v425_v0  ;;  %v438_v50 = vsel %vm2124_vm0, %v1416_v10, 2147483647 }
  0x56   :  { %v1445_v51 = vsel %vm396_vm4, %v394_v45, %v395_v47  ;;  %vm409_vm5 = vcmp.lt.s32.totalorder %v407_v48, %v408_v49  ;;  %v428_v54 = vrot.slane %v427_v13, 4  ;;  %vm439_vm6 = vcmp.lt.s32.totalorder %v437_v44, %v438_v50 }
  0x57   :  { %2183 = vst [vmem:[#allocation9_spill] sm:$0xff] %v1445_v51  ;;  %v1447_v11 = vsel %vm409_vm5, %v407_v48, %v408_v49  ;;  %vm419_vm7 = vcmp.lt.s32.totalorder %v417_v19, %v418_v24  ;;  %v440_v55 = vsel %vm439_vm6, %v437_v44, %v438_v50  ;;  %v450_v56 = vsel %vm2124_vm0, %v1425_v52, 2147483647 }
  0x58   :  { %2184 = vst [vmem:[#allocation10_spill] sm:$0xff] %v1447_v11  ;;  %v420_v57 = vsel %vm419_vm7, %v417_v19, %v418_v24  ;;  %vm429_vm8 = vcmp.lt.s32.totalorder %v427_v13, %v428_v54  ;;  %v441_v20 = vrot.slane %v440_v55, 4  ;;  %v451_v25 = vsel %vm2124_vm0, %v1428_v21, 2147483647 }
  0x59   :  { %v421_v12 = vrot.slane %v420_v57, 1  ;;  %v430_v10 = vsel %vm429_vm8, %v427_v13, %v428_v54  ;;  %vm452_vm9 = vcmp.lt.s32.totalorder %v450_v56, %v451_v25  ;;  %vm2139_vm10 = vcmp.eq.s32.totalorder %v1175_v4, %v1439_v46 }
  0x5a   :  { %v431_v22 = vrot.slane %v430_v10, 2  ;;  %vm442_vm11 = vcmp.lt.s32.totalorder %v440_v55, %v441_v20  ;;  %v453_v23 = vsel %vm452_vm9, %v450_v56, %v451_v25  ;;  %vm2138_vm12 = vcmp.eq.s32.totalorder %v1218_v15, %v1439_v46 }
  0x5b   :  { %vm422_vm13 = vcmp.lt.s32.totalorder %v420_v57, %v421_v12  ;;  %v443_v52 = vsel %vm442_vm11, %v440_v55, %v441_v20  ;;  %v454_v40 = vrot.slane %v453_v23, 4  ;;  %vm2137_vm14 = vcmp.eq.s32.totalorder %v1175_v4, %v1441_v18 }
  0x5c   :  { %v1459_v41 = vsel %vm422_vm13, %v420_v57, %v421_v12  ;;  %vm432_vm15 = vcmp.lt.s32.totalorder %v430_v10, %v431_v22  ;;  %v444_v21 = vrot.slane %v443_v52, 2  ;;  %vm2132_vm1 = vcmp.eq.s32.totalorder %v1218_v15, %v1441_v18 }
  0x5d   :  { %2185 = vst [vmem:[#allocation11_spill] sm:$0xff] %v1459_v41  ;;  %v433_v42 = vsel %vm432_vm15, %v430_v10, %v431_v22  ;;  %vm455_vm2 = vcmp.lt.s32.totalorder %v453_v23, %v454_v40  ;;  %vm2133_vm3 = vcmp.eq.s32.totalorder %v1175_v4, %v1445_v51  ;;  %vm2134_vm4 = vcmp.eq.s32.totalorder %v1218_v15, %v1445_v51 }
  0x5e   :  { %v434_v16 = vrot.slane %v433_v42, 1  ;;  %vm445_vm5 = vcmp.lt.s32.totalorder %v443_v52, %v444_v21  ;;  %v456_v17 = vsel %vm455_vm2, %v453_v23, %v454_v40  ;;  %vm2135_vm6 = vcmp.eq.s32.totalorder %v1175_v4, %v1447_v11 }
  0x5f   :  { %v446_v43 = vsel %vm445_vm5, %v443_v52, %v444_v21  ;;  %v457_v26 = vrot.slane %v456_v17, 2  ;;  %vm2136_vm7 = vcmp.eq.s32.totalorder %v1218_v15, %v1447_v11  ;;  %vm2131_vm8 = vcmp.eq.s32.totalorder %v1175_v4, %v1459_v41 }
  0x60   :  { %vm435_vm9 = vcmp.lt.s32.totalorder %v433_v42, %v434_v16  ;;  %v447_v27 = vrot.slane %v446_v43, 1  ;;  %vm2123_vm11 = vcmp.eq.s32.totalorder %v1218_v15, %v1459_v41  ;;  %v479_v29 = vsel %vm2139_vm10, %v2186_v28, 0.0 }
  0x61   :  { %v1479_v30 = vsel %vm435_vm9, %v433_v42, %v434_v16  ;;  %vm458_vm13 = vcmp.lt.s32.totalorder %v456_v17, %v457_v26  ;;  %v480_v32 = vsel %vm2138_vm12, %v2188_v31, 0.0  ;;  %v481_v33 = vsel %vm2137_vm14, %v2186_v28, 0.0 }
  0x62   :  { %2187 = vst [vmem:[#allocation3_spill] sm:$0xff] %v1479_v30  ;;  %vm448_vm15 = vcmp.lt.s32.totalorder %v446_v43, %v447_v27  ;;  %v459_v34 = vsel %vm458_vm13, %v456_v17, %v457_v26  ;;  %vm2130_vm2 = vcmp.eq.s32.totalorder %v1175_v4, %v1479_v30  ;;  %vm2129_vm5 = vcmp.eq.s32.totalorder %v1218_v15, %v1479_v30 }
  0x63   :  { %v1493_v35 = vsel %vm448_vm15, %v446_v43, %v447_v27  ;;  %v460_v36 = vrot.slane %v459_v34, 1  ;;  %v482_v37 = vsel %vm2132_vm1, %v2188_v31, 0.0  ;;  %v483_v38 = vsel %vm2133_vm3, %v2186_v28, 0.0 }
  0x64   :  { %2189 = vst [vmem:[#allocation4_spill] sm:$0xff] %v1493_v35  ;;  %vm2128_vm9 = vcmp.eq.s32.totalorder %v1175_v4, %v1493_v35  ;;  %vm2127_vm13 = vcmp.eq.s32.totalorder %v1218_v15, %v1493_v35  ;;  %v484_v14 = vsel %vm2134_vm4, %v2188_v31, 0.0  ;;  %v485_v39 = vsel %vm2135_vm6, %v2186_v28, 0.0 }
  0x65   :  { %vm461_vm15 = vcmp.lt.s32.totalorder %v459_v34, %v460_v36  ;;  %v486_v58 = vsel %vm2136_vm7, %v2188_v31, 0.0  ;;  %v487_v59 = vsel %vm2131_vm8, %v2186_v28, 0.0  ;;  %v488_v60 = vsel %vm2123_vm11, %v2188_v31, 0.0 }
  0x66   :  { %v1527_v61 = vsel %vm461_vm15, %v459_v34, %v460_v36  ;;  %v489_v62 = vsel %vm2130_vm2, %v2186_v28, 0.0  ;;  %v490_v63 = vsel %vm2129_vm5, %v2188_v31, 0.0  ;;  %v491_v0 = vsel %vm2128_vm9, %v2186_v28, 0.0 }
  0x67   :  { %2190 = vst [vmem:[#allocation12_spill] sm:$0xff] %v1527_v61  ;;  %vm2126_vm11 = vcmp.eq.s32.totalorder %v1175_v4, %v1527_v61  ;;  %vm2125_vm15 = vcmp.eq.s32.totalorder %v1218_v15, %v1527_v61  ;;  %v492_v44 = vsel %vm2127_vm13, %v2188_v31, 0.0  ;;  %v495_v45 = vsel %vm2124_vm0, %v479_v29, 0.0 }
  0x68   :  { %v493_v47 = vsel %vm2126_vm11, %v2186_v28, 0.0  ;;  %v494_v48 = vsel %vm2125_vm15, %v2188_v31, 0.0  ;;  %v496_v49 = vsel %vm2124_vm0, %v480_v32, 0.0  ;;  %v504_v19 = vsel %vm2124_vm0, %v481_v33, 0.0 }
  0x69   :  { %v497_v24 = vadd.f32 %v496_v49, %v495_v45  ;;  %v505_v13 = vsel %vm2124_vm0, %v482_v37, 0.0  ;;  %v513_v50 = vsel %vm2124_vm0, %v483_v38, 0.0  ;;  %v514_v54 = vsel %vm2124_vm0, %v484_v14, 0.0 }
  0x6a   :  { %v506_v55 = vadd.f32 %v505_v13, %v504_v19  ;;  %v515_v56 = vadd.f32 %v514_v54, %v513_v50  ;;  %v522_v57 = vsel %vm2124_vm0, %v485_v39, 0.0  ;;  %v523_v20 = vsel %vm2124_vm0, %v486_v58, 0.0 }
  0x6b   :  { %v498_v25 = vrot.slane %v497_v24, 4  ;;  %v524_v12 = vadd.f32 %v523_v20, %v522_v57  ;;  %v531_v10 = vsel %vm2124_vm0, %v487_v59, 0.0  ;;  %v532_v22 = vsel %vm2124_vm0, %v488_v60, 0.0 }
  0x6c   :  { %v507_v23 = vrot.slane %v506_v55, 4  ;;  %v516_v52 = vrot.slane %v515_v56, 4  ;;  %v533_v40 = vadd.f32 %v532_v22, %v531_v10  ;;  %v540_v21 = vsel %vm2124_vm0, %v489_v62, 0.0 }
  0x6d   :  { %v499_v42 = vadd.f32 %v498_v25, %v497_v24  ;;  %v525_v16 = vrot.slane %v524_v12, 4  ;;  %v541_v17 = vsel %vm2124_vm0, %v490_v63, 0.0  ;;  %v549_v43 = vsel %vm2124_vm0, %v491_v0, 0.0 }
  0x6e   :  { %v508_v26 = vadd.f32 %v507_v23, %v506_v55  ;;  %v517_v27 = vadd.f32 %v516_v52, %v515_v56  ;;  %v534_v28 = vrot.slane %v533_v40, 4  ;;  %v542_v29 = vadd.f32 %v541_v17, %v540_v21 }
  0x6f   :  { %v500_v31 = vrot.slane %v499_v42, 2  ;;  %v526_v32 = vadd.f32 %v525_v16, %v524_v12  ;;  %v550_v33 = vsel %vm2124_vm0, %v492_v44, 0.0  ;;  %v558_v34 = vsel %vm2124_vm0, %v493_v47, 0.0 }
  0x70   :  { %v509_v36 = vrot.slane %v508_v26, 2  ;;  %v518_v37 = vrot.slane %v517_v27, 2  ;;  %v535_v38 = vadd.f32 %v534_v28, %v533_v40  ;;  %v543_v14 = vrot.slane %v542_v29, 4 }
  0x71   :  { %v501_v39 = vadd.f32 %v500_v31, %v499_v42  ;;  %v527_v58 = vrot.slane %v526_v32, 2  ;;  %v551_v59 = vadd.f32 %v550_v33, %v549_v43  ;;  %v559_v60 = vsel %vm2124_vm0, %v494_v48, 0.0 }
  0x72   :  { %v510_v62 = vadd.f32 %v509_v36, %v508_v26  ;;  %v519_v63 = vadd.f32 %v518_v37, %v517_v27  ;;  %v536_v0 = vrot.slane %v535_v38, 2  ;;  %v544_v45 = vadd.f32 %v543_v14, %v542_v29 }
  0x73   :  { %v502_v49 = vrot.slane %v501_v39, 1  ;;  %v528_v19 = vadd.f32 %v527_v58, %v526_v32  ;;  %v552_v24 = vrot.slane %v551_v59, 4  ;;  %v560_v13 = vadd.f32 %v559_v60, %v558_v34 }
  0x74   :  { %v511_v44 = vrot.slane %v510_v62, 1  ;;  %v520_v50 = vrot.slane %v519_v63, 1  ;;  %v537_v47 = vadd.f32 %v536_v0, %v535_v38  ;;  %v545_v54 = vrot.slane %v544_v45, 2 }
  0x75   :  { %v503_v55 = vadd.f32 %v502_v49, %v501_v39  ;;  %v529_v56 = vrot.slane %v528_v19, 1  ;;  %v553_v57 = vadd.f32 %v552_v24, %v551_v59  ;;  %v561_v20 = vrot.slane %v560_v13, 4 }
  0x76   :  { %v512_v25 = vadd.f32 %v511_v44, %v510_v62  ;;  %v521_v12 = vadd.f32 %v520_v50, %v519_v63  ;;  %v538_v10 = vrot.slane %v537_v47, 1  ;;  %v546_v48 = vadd.f32 %v545_v54, %v544_v45 }
  0x77   :  { %v530_v22 = vadd.f32 %v529_v56, %v528_v19  ;;  %v554_v23 = vrot.slane %v553_v57, 2  ;;  %v562_v52 = vadd.f32 %v561_v20, %v560_v13  ;;  %v567_v40 = vsub.f32 %v1163_v1, %v503_v55  ;;  %v1912_v19 = vld [vmem:[%s2114_s1 + $0x20] sm:$0xff] }
  0x78   :  { %v539_v21 = vadd.f32 %v538_v10, %v537_v47  ;;  %v547_v42 = vrot.slane %v546_v48, 1  ;;  %v568_v16 = vsub.f32 %v1168_v2, %v512_v25  ;;  %v569_v17 = vsub.f32 %v1173_v3, %v521_v12  ;;  %v2266_v12 = vld [vmem:[#allocation7_spill] sm:$0xff] }
  0x79   :  { %v555_v43 = vadd.f32 %v554_v23, %v553_v57  ;;  %v563_v26 = vrot.slane %v562_v52, 2  ;;  %v570_v27 = vsub.f32 %v1180_v5, %v530_v22  ;;  %v575_v28 = vand.u32 2147483647, %v567_v40 }
  0x7a   :  { %v548_v29 = vadd.f32 %v547_v42, %v546_v48  ;;  %v571_v31 = vsub.f32 %v1185_v6, %v539_v21  ;;  %v576_v32 = vand.u32 2147483647, %v568_v16  ;;  %v577_v33 = vand.u32 2147483647, %v569_v17 }
  0x7b   :  { %v556_v34 = vrot.slane %v555_v43, 1  ;;  %v564_v36 = vadd.f32 %v563_v26, %v562_v52  ;;  %v578_v37 = vand.u32 2147483647, %v570_v27  ;;  %vm1578_vm0 = vcmp.lt.f32.partialorder %v575_v28, 1.0 }
  0x7c   :  { %v572_v2 = vsub.f32 %v1190_v7, %v548_v29  ;;  %v579_v3 = vand.u32 2147483647, %v571_v31  ;;  %vm1583_vm15 = vcmp.lt.f32.partialorder %v576_v32, 1.0  ;;  %vm1587_vm11 = vcmp.lt.f32.partialorder %v577_v33, 1.0 }
  0x7d   :  { %v557_v6 = vadd.f32 %v556_v34, %v555_v43  ;;  %v565_v14 = vrot.slane %v564_v36, 1  ;;  %vm1591_vm13 = vcmp.lt.f32.partialorder %v578_v37, 1.0  ;;  %v591_v58 = vmul.f32 0.5, %v567_v40  ;;  %v2208_v34 = vld [vmem:[#allocation6_spill] sm:$0xff] }
  0x7e   :  { %v580_v59 = vand.u32 2147483647, %v572_v2  ;;  %vm1595_vm9 = vcmp.lt.f32.partialorder %v579_v3, 1.0  ;;  %v592_v7 = vmul.f32 0.5, %v568_v16  ;;  %v593_v62 = vmul.f32 0.5, %v569_v17 }
  0x7f   :  { %v566_v63 = vadd.f32 %v565_v14, %v564_v36  ;;  %v573_v0 = vsub.f32 %v1195_v8, %v557_v6  ;;  %v594_v45 = vmul.f32 0.5, %v570_v27  ;;  %v595_v49 = vmul.f32 0.5, %v571_v31 }
  0x80   :  { %vm1600_vm5 = vcmp.lt.f32.partialorder %v580_v59, 1.0  ;;  %v596_v24 = vmul.f32 0.5, %v572_v2  ;;  %v1604_v13 = vmul.f32 %v591_v58, %v567_v40  ;;  %v1606_v44 = vmul.f32 %v592_v7, %v568_v16 }
  0x81   :  { %v574_v50 = vsub.f32 %v1200_v9, %v566_v63  ;;  %v581_v47 = vand.u32 2147483647, %v573_v0  ;;  %v597_v54 = vmul.f32 0.5, %v573_v0  ;;  %v1609_v55 = vmul.f32 %v593_v62, %v569_v17 }
  0x82   :  { %v1611_v56 = vmul.f32 %v594_v45, %v570_v27  ;;  %v1613_v8 = vmul.f32 %v595_v49, %v571_v31  ;;  %v1615_v57 = vmul.f32 %v596_v24, %v572_v2  ;;  %v1617_v20 = vadd.f32 -0.5, %v575_v28 }
  0x83   :  { %v582_v25 = vand.u32 2147483647, %v574_v50  ;;  %vm1619_vm2 = vcmp.lt.f32.partialorder %v581_v47, 1.0  ;;  %v598_v10 = vmul.f32 0.5, %v574_v50  ;;  %v1623_v48 = vmul.f32 %v597_v54, %v573_v0 }
  0x84   :  { %v1625_v9 = vadd.f32 -0.5, %v576_v32  ;;  %v1627_v22 = vadd.f32 -0.5, %v577_v33  ;;  %v1629_v23 = vadd.f32 -0.5, %v578_v37  ;;  %v1631_v52 = vadd.f32 -0.5, %v579_v3 }
  0x85   :  { %vm1633_vm8 = vcmp.lt.f32.partialorder %v582_v25, 1.0  ;;  %v2205_v40 = vmov 0  ;;  %v1637_v21 = vmul.f32 %v598_v10, %v574_v50  ;;  %v1639_v42 = vadd.f32 -0.5, %v580_v59 }
  0x86   :  { %v2206_v40 = vsel %vm1633_vm8, 4294967295, %v2205_v40  ;;  %v1641_v16 = vadd.f32 -0.5, %v581_v47  ;;  %v1643_v17 = vadd.f32 -0.5, %v582_v25  ;;  %v623_v36 = vsel %vm2139_vm10, %v2208_v34, 0.0 }
  0x87   :  { %v624_v37 = vsel %vm2138_vm12, %v1252_v53, 0.0  ;;  %v625_v2 = vsel %vm2137_vm14, %v2208_v34, 0.0  ;;  %v626_v3 = vsel %vm2132_vm1, %v1252_v53, 0.0  ;;  %v627_v6 = vsel %vm2133_vm3, %v2208_v34, 0.0 }
  0x88   :  { %2207 = vst [vmem:[#allocation13_spill] sm:$0xff] %v1643_v17  ;;  %v628_v14 = vsel %vm2134_vm4, %v1252_v53, 0.0  ;;  %v629_v58 = vsel %vm2135_vm6, %v2208_v34, 0.0  ;;  %v630_v59 = vsel %vm2136_vm7, %v1252_v53, 0.0  ;;  %vm2209_vm1 = vcmp.eq.s32.totalorder %v1175_v4, %v1459_v41 }
  0x89   :  { %v631_v7 = vsel %vm2209_vm1, %v2208_v34, 0.0  ;;  %vm2210_vm3 = vcmp.eq.s32.totalorder %v1218_v15, %v1459_v41  ;;  %vm2211_vm4 = vcmp.eq.s32.totalorder %v1175_v4, %v1479_v30  ;;  %vm2212_vm6 = vcmp.eq.s32.totalorder %v1218_v15, %v1479_v30 }
  0x8a   :  { %v632_v62 = vsel %vm2210_vm3, %v1252_v53, 0.0  ;;  %v633_v63 = vsel %vm2211_vm4, %v2208_v34, 0.0  ;;  %v634_v0 = vsel %vm2212_vm6, %v1252_v53, 0.0  ;;  %vm2213_vm7 = vcmp.eq.s32.totalorder %v1175_v4, %v1493_v35 }
  0x8b   :  { %v635_v45 = vsel %vm2213_vm7, %v2208_v34, 0.0  ;;  %vm2214_vm1 = vcmp.eq.s32.totalorder %v1218_v15, %v1493_v35  ;;  %vm2215_vm3 = vcmp.eq.s32.totalorder %v1175_v4, %v1527_v61  ;;  %vm2216_vm4 = vcmp.eq.s32.totalorder %v1218_v15, %v1527_v61 }
  0x8c   :  { %v636_v49 = vsel %vm2214_vm1, %v1252_v53, 0.0  ;;  %v637_v24 = vsel %vm2215_vm3, %v2208_v34, 0.0  ;;  %v638_v50 = vsel %vm2216_vm4, %v1252_v53, 0.0  ;;  %vm2217_vm6 = vcmask 64512  }
  0x8d   :  { %v639_v47 = vsel %vm2217_vm6, %v623_v36, 0.0  ;;  %vm2218_vm14 = vmmov %vm2217_vm6  ;;  %v2256_v46 = vsel %vm1583_vm15, %v1606_v44, %v1625_v9  ;;  %v2258_v1 = vsel %vm1591_vm13, %v1611_v56, %v1629_v23  ;;  %v2259_v38 = vsel %vm1595_vm9, %v1613_v8, %v1631_v52  ;;  %v2270_v52 = vld [vmem:[#allocation8_spill] sm:$0xff] }
  0x8e   :  { %v640_v54 = vsel %vm2218_vm14, %v624_v37, 0.0  ;;  %vm2219_vm7 = vmmov %vm2217_vm6  ;;  %v2260_v5 = vsel %vm1600_vm5, %v1615_v57, %v1639_v42  ;;  %v2261_v39 = vsel %vm1619_vm2, %v1623_v48, %v1641_v16  ;;  %v2265_v57 = vld [vmem:[#allocation2_spill] sm:$0xff]  ;;  %v1921_v48 = vld [vmem:[%s2114_s1 + $0x28] sm:$0xff] }
  0x8f   :  { %v648_v25 = vsel %vm2219_vm7, %v625_v2, 0.0  ;;  %v641_v10 = vadd.f32 %v640_v54, %v639_v47  ;;  %vm2220_vm12 = vmmov %vm2217_vm6  ;;  %v2263_v60 = vld [vmem:[#allocation13_spill] sm:$0xff]  ;;  %vm2271_vm5 = vcmp.eq.s32.totalorder %v2265_v57, %v2270_v52 }
  0x90   :  { %v649_v33 = vsel %vm2220_vm12, %v626_v3, 0.0  ;;  %vm2221_vm1 = vmmov %vm2217_vm6  ;;  %v2273_v42 = vld [vmem:[#allocation9_spill] sm:$0xff] }
  0x91   :  { %v657_v32 = vsel %vm2221_vm1, %v627_v6, 0.0  ;;  %vm2222_vm10 = vmmov %vm2221_vm1  ;;  %v650_v29 = vadd.f32 %v649_v33, %v648_v25  ;;  %v642_v53 = vrot.slane %v641_v10, 4  ;;  %vm2274_vm13 = vcmp.eq.s32.totalorder %v2265_v57, %v2273_v42 }
  0x92   :  { %v658_v31 = vsel %vm2222_vm10, %v628_v14, 0.0  ;;  %vm2223_vm3 = vmmov %vm2221_vm1  ;;  %v803_v16 = vsel %vm2274_vm13, %v1912_v19, 0.0 }
  0x93   :  { %v659_v34 = vadd.f32 %v658_v31, %v657_v32  ;;  %v666_v28 = vsel %vm2223_vm3, %v629_v58, 0.0  ;;  %vm2224_vm8 = vmmov %vm2221_vm1  ;;  %v651_v2 = vrot.slane %v650_v29, 4  ;;  %v643_v6 = vadd.f32 %v642_v53, %v641_v10 }
  0x94   :  { %v667_v27 = vsel %vm2224_vm8, %v630_v59, 0.0  ;;  %vm2225_vm4 = vmmov %vm2221_vm1 }
  0x95   :  { %v668_v26 = vadd.f32 %v667_v27, %v666_v28  ;;  %v675_v36 = vsel %vm2225_vm4, %v631_v7, 0.0  ;;  %vm2226_vm14 = vmmov %vm2221_vm1  ;;  %v660_v47 = vrot.slane %v659_v34, 4  ;;  %v652_v32 = vadd.f32 %v651_v2, %v650_v29 }
  0x96   :  { %v676_v37 = vsel %vm2226_vm14, %v632_v62, 0.0  ;;  %vm2227_vm12 = vmmov %vm2221_vm1  ;;  %v644_v27 = vrot.slane %v643_v6, 2 }
  0x97   :  { %v677_v54 = vadd.f32 %v676_v37, %v675_v36  ;;  %v684_v3 = vsel %vm2227_vm12, %v633_v63, 0.0  ;;  %v669_v43 = vrot.slane %v668_v26, 4  ;;  %vm2228_vm10 = vmmov %vm2221_vm1  ;;  %v661_v14 = vadd.f32 %v660_v47, %v659_v34 }
  0x98   :  { %v685_v33 = vsel %vm2228_vm10, %v634_v0, 0.0  ;;  %vm2229_vm6 = vmmov %vm2221_vm1  ;;  %v653_v25 = vrot.slane %v652_v32, 2  ;;  %v645_v10 = vadd.f32 %v644_v27, %v643_v6  ;;  %v703_v0 = vsel %vm2221_vm1, %v638_v50, 0.0 }
  0x99   :  { %v693_v31 = vsel %vm2229_vm6, %v635_v45, 0.0  ;;  %v678_v58 = vrot.slane %v677_v54, 4  ;;  %v686_v59 = vadd.f32 %v685_v33, %v684_v3  ;;  %v670_v28 = vadd.f32 %v669_v43, %v668_v26  ;;  %vm2230_vm8 = vmmov %vm2221_vm1 }
  0x9a   :  { %v694_v7 = vsel %vm2230_vm8, %v636_v49, 0.0  ;;  %vm2231_vm7 = vmmov %vm2221_vm1  ;;  %v662_v36 = vrot.slane %v661_v14, 2  ;;  %v654_v45 = vadd.f32 %v653_v25, %v652_v32  ;;  %v646_v47 = vrot.slane %v645_v10, 1 }
  0x9b   :  { %v702_v62 = vsel %vm2231_vm7, %v637_v24, 0.0  ;;  %v679_v37 = vadd.f32 %v678_v58, %v677_v54  ;;  %v687_v63 = vrot.slane %v686_v59, 4  ;;  %v671_v53 = vrot.slane %v670_v28, 2 }
  0x9c   :  { %v695_v61 = vadd.f32 %v694_v7, %v693_v31  ;;  %v663_v29 = vadd.f32 %v662_v36, %v661_v14  ;;  %v704_v26 = vadd.f32 %v703_v0, %v702_v62  ;;  %v655_v49 = vrot.slane %v654_v45, 1 }
  0x9d   :  { %v680_v34 = vrot.slane %v679_v37, 2  ;;  %v688_v2 = vadd.f32 %v687_v63, %v686_v59  ;;  %v672_v3 = vadd.f32 %v671_v53, %v670_v28  ;;  %v647_v30 = vadd.f32 %v646_v47, %v645_v10  ;;  %v1760_v59 = vld [vmem:[%s2113_s0] sm:$0x7] }
  0x9e   :  { %v696_v43 = vrot.slane %v695_v61, 4  ;;  %v664_v33 = vrot.slane %v663_v29, 1  ;;  %v705_v6 = vrot.slane %v704_v26, 4  ;;  %v656_v27 = vadd.f32 %v655_v49, %v654_v45  ;;  %2232 = vst [vmem:[#allocation6_spill] sm:$0xff] %v1760_v59 }
  0x9f   :  { %v681_v24 = vadd.f32 %v680_v34, %v679_v37  ;;  %v689_v35 = vrot.slane %v688_v2, 2  ;;  %v673_v54 = vrot.slane %v672_v3, 1  ;;  %v711_v28 = vsub.f32 %v1760_v59, %v647_v30  ;;  %v1778_v30 = vld [vmem:[%s2113_s0 + $0xc] sm:$0x7]  ;;  %v1784_v34 = vld [vmem:[%s2113_s0 + $0x10] sm:$0x7] }
  0xa0   :  { %v697_v58 = vadd.f32 %v696_v43, %v695_v61  ;;  %v665_v31 = vadd.f32 %v664_v33, %v663_v29  ;;  %v706_v25 = vadd.f32 %v705_v6, %v704_v26  ;;  %v1766_v61 = vld [vmem:[%s2113_s0 + $0x4] sm:$0x7]  ;;  %2235 = vst [vmem:[#allocation16_spill] sm:$0xff] %v1778_v30  ;;  %2236 = vst [vmem:[#allocation17_spill] sm:$0xff] %v1784_v34 }
  0xa1   :  { %v682_v7 = vrot.slane %v681_v24, 1  ;;  %v690_v50 = vadd.f32 %v689_v35, %v688_v2  ;;  %v674_v32 = vadd.f32 %v673_v54, %v672_v3  ;;  %2233 = vst [vmem:[#allocation14_spill] sm:$0xff] %v1766_v61  ;;  %v712_v37 = vsub.f32 %v1766_v61, %v656_v27  ;;  %v1772_v35 = vld [vmem:[%s2113_s0 + $0x8] sm:$0x7] }
  0xa2   :  { %v698_v14 = vrot.slane %v697_v58, 2  ;;  %2234 = vst [vmem:[#allocation15_spill] sm:$0xff] %v1772_v35  ;;  %v713_v63 = vsub.f32 %v1772_v35, %v665_v31  ;;  %v707_v53 = vrot.slane %v706_v25, 2  ;;  %v719_v45 = vand.u32 2147483647, %v711_v28 }
  0xa3   :  { %v683_v62 = vadd.f32 %v682_v7, %v681_v24  ;;  %v691_v36 = vrot.slane %v690_v50, 1  ;;  %v714_v0 = vsub.f32 %v1778_v30, %v674_v32  ;;  %v720_v47 = vand.u32 2147483647, %v712_v37  ;;  %v1794_v24 = vld [vmem:[%s2113_s0 + $0x14] sm:$0x7] }
  0xa4   :  { %v699_v10 = vadd.f32 %v698_v14, %v697_v58  ;;  %v721_v3 = vand.u32 2147483647, %v713_v63  ;;  %v708_v26 = vadd.f32 %v707_v53, %v706_v25  ;;  %vm1787_vm3 = vcmp.lt.f32.partialorder %v719_v45, 1.0  ;;  %2239 = vst [vmem:[#allocation18_spill] sm:$0xff] %v1794_v24 }
  0xa5   :  { %v692_v29 = vadd.f32 %v691_v36, %v690_v50  ;;  %v715_v2 = vsub.f32 %v1784_v34, %v683_v62  ;;  %v722_v49 = vand.u32 2147483647, %v714_v0  ;;  %vm1797_vm4 = vcmp.lt.f32.partialorder %v720_v47, 1.0 }
  0xa6   :  { %v700_v43 = vrot.slane %v699_v10, 1  ;;  %vm1801_vm14 = vcmp.lt.f32.partialorder %v721_v3, 1.0  ;;  %v709_v7 = vrot.slane %v708_v26, 1  ;;  %v735_v32 = vmul.f32 0.5, %v711_v28 }
  0xa7   :  { %v716_v54 = vsub.f32 %v1794_v24, %v692_v29  ;;  %v723_v58 = vand.u32 2147483647, %v715_v2  ;;  %vm1805_vm12 = vcmp.lt.f32.partialorder %v722_v49, 1.0  ;;  %v736_v62 = vmul.f32 0.5, %v712_v37  ;;  %v1816_v29 = vld [vmem:[%s2113_s0 + $0x18] sm:$0x7] }
  0xa8   :  { %v701_v31 = vadd.f32 %v700_v43, %v699_v10  ;;  %v737_v36 = vmul.f32 0.5, %v713_v63  ;;  %v710_v53 = vadd.f32 %v709_v7, %v708_v26  ;;  %2248 = vst [vmem:[#allocation19_spill] sm:$0xff] %v1816_v29  ;;  %v738_v43 = vmul.f32 0.5, %v714_v0  ;;  %v1826_v26 = vld [vmem:[%s2113_s0 + $0x1c] sm:$0x7] }
  0xa9   :  { %v724_v14 = vand.u32 2147483647, %v716_v54  ;;  %vm1809_vm10 = vcmp.lt.f32.partialorder %v723_v58, 1.0  ;;  %v739_v24 = vmul.f32 0.5, %v715_v2  ;;  %v740_v30 = vmul.f32 0.5, %v716_v54 }
  0xaa   :  { %v717_v10 = vsub.f32 %v1816_v29, %v701_v31  ;;  %v743_v35 = vmul.f32 %v735_v32, %v711_v28  ;;  %v744_v61 = vmul.f32 %v736_v62, %v712_v37  ;;  %v718_v7 = vsub.f32 %v1826_v26, %v710_v53  ;;  %v2288_v53 = vld [vmem:[#allocation12_spill] sm:$0xff] }
  0xab   :  { %vm1819_vm6 = vcmp.lt.f32.partialorder %v724_v14, 1.0  ;;  %v745_v11 = vmul.f32 %v737_v36, %v713_v63  ;;  %v746_v31 = vmul.f32 %v738_v43, %v714_v0  ;;  %v747_v29 = vmul.f32 %v739_v24, %v715_v2 }
  0xac   :  { %v725_v59 = vand.u32 2147483647, %v717_v10  ;;  %v741_v41 = vmul.f32 0.5, %v717_v10  ;;  %v748_v51 = vmul.f32 %v740_v30, %v716_v54  ;;  %v1109_v18 = vadd.f32 -0.5, %v719_v45 }
  0xad   :  { %v726_v15 = vand.u32 2147483647, %v718_v7  ;;  %v742_v28 = vmul.f32 0.5, %v718_v7  ;;  %v1110_v32 = vadd.f32 -0.5, %v720_v47  ;;  %v1111_v62 = vadd.f32 -0.5, %v721_v3 }
  0xae   :  { %vm1829_vm8 = vcmp.lt.f32.partialorder %v725_v59, 1.0  ;;  %v749_v37 = vmul.f32 %v741_v41, %v717_v10  ;;  %v1112_v4 = vadd.f32 -0.5, %v722_v49  ;;  %v1113_v17 = vadd.f32 -0.5, %v723_v58 }
  0xaf   :  { %vm1833_vm7 = vcmp.lt.f32.partialorder %v726_v15, 1.0  ;;  %v750_v63 = vmul.f32 %v742_v28, %v718_v7  ;;  %v1114_v0 = vadd.f32 -0.5, %v724_v14  ;;  %v1115_v2 = vadd.f32 -0.5, %v725_v59  ;;  %v2276_v14 = vld [vmem:[#allocation10_spill] sm:$0xff]  ;;  %v2282_v7 = vld [vmem:[#allocation3_spill] sm:$0xff] }
  0xb0   :  { %v1116_v30 = vadd.f32 -0.5, %v726_v15  ;;  %v759_v45 = vsel %vm1787_vm3, %v743_v35, %v1109_v18  ;;  %v760_v24 = vsel %vm1797_vm4, %v744_v61, %v1110_v32  ;;  %v761_v41 = vsel %vm1801_vm14, %v745_v11, %v1111_v62 }
  0xb1   :  { %v762_v47 = vsel %vm1805_vm12, %v746_v31, %v1112_v4  ;;  %v763_v3 = vsel %vm1809_vm10, %v747_v29, %v1113_v17  ;;  %v764_v49 = vsel %vm1819_vm6, %v748_v51, %v1114_v0  ;;  %v765_v15 = vsel %vm1829_vm8, %v749_v37, %v1115_v2  ;;  %v2279_v29 = vld [vmem:[#allocation11_spill] sm:$0xff]  ;;  %v2285_v37 = vld [vmem:[#allocation4_spill] sm:$0xff] }
  0xb2   :  { %v766_v18 = vsel %vm1833_vm7, %v750_v63, %v1116_v30  ;;  %v775_v59 = vrot.slane %v759_v45, 1  ;;  %v776_v61 = vrot.slane %v760_v24, 1  ;;  %v777_v35 = vrot.slane %v761_v41, 1 }
  0xb3   :  { %v778_v33 = vrot.slane %v762_v47, 1  ;;  %v779_v11 = vrot.slane %v763_v3, 1  ;;  %v780_v54 = vrot.slane %v764_v49, 1  ;;  %v781_v58 = vrot.slane %v765_v15, 1 }
  0xb4   :  { %v782_v4 = vrot.slane %v766_v18, 1  ;;  %v2255_v17 = vsel %vm1578_vm0, %v1604_v13, %v1617_v20  ;;  %v1865_v34 = vadd.f32 %v776_v61, %v2256_v46  ;;  %v2257_v6 = vsel %vm1587_vm11, %v1609_v55, %v1627_v22  ;;  %v2268_v22 = vld [vmem:[#allocation5_spill] sm:$0xff] }
  0xb5   :  { %v1858_v51 = vadd.f32 %v775_v59, %v2255_v17  ;;  %v1872_v27 = vadd.f32 %v777_v35, %v2257_v6  ;;  %v1879_v13 = vadd.f32 %v778_v33, %v2258_v1  ;;  %v1886_v44 = vadd.f32 %v779_v11, %v2259_v38 }
  0xb6   :  { %v1893_v55 = vadd.f32 %v780_v54, %v2260_v5  ;;  %v1900_v56 = vadd.f32 %v781_v58, %v2261_v39  ;;  %vm2262_vm0 = vnez %v2206_v40  ;;  %vm2267_vm11 = vcmp.eq.s32.totalorder %v2265_v57, %v2266_v12 }
  0xb7   :  { %v2264_v8 = vsel %vm2262_vm0, %v1637_v21, %v2263_v60  ;;  %v799_v9 = vsel %vm2267_vm11, %v1912_v19, 0.0  ;;  %vm2269_vm2 = vcmp.eq.s32.totalorder %v2268_v22, %v2266_v12  ;;  %v801_v40 = vsel %vm2271_vm5, %v1912_v19, 0.0 }
  0xb8   :  { %v1907_v20 = vadd.f32 %v782_v4, %v2264_v8  ;;  %v800_v23 = vsel %vm2269_vm2, %v1921_v48, 0.0  ;;  %vm2272_vm9 = vcmp.eq.s32.totalorder %v2268_v22, %v2270_v52  ;;  %vm2275_vm15 = vcmp.eq.s32.totalorder %v2268_v22, %v2273_v42 }
  0xb9   :  { %v802_v21 = vsel %vm2272_vm9, %v1921_v48, 0.0  ;;  %v804_v50 = vsel %vm2275_vm15, %v1921_v48, 0.0  ;;  %vm2277_vm1 = vcmp.eq.s32.totalorder %v2265_v57, %v2276_v14  ;;  %vm2278_vm3 = vcmp.eq.s32.totalorder %v2268_v22, %v2276_v14 }
  0xba   :  { %v805_v25 = vsel %vm2277_vm1, %v1912_v19, 0.0  ;;  %v806_v36 = vsel %vm2278_vm3, %v1921_v48, 0.0  ;;  %vm2280_vm4 = vcmp.eq.s32.totalorder %v2265_v57, %v2279_v29  ;;  %vm2281_vm14 = vcmp.eq.s32.totalorder %v2268_v22, %v2279_v29 }
  0xbb   :  { %v807_v10 = vsel %vm2280_vm4, %v1912_v19, 0.0  ;;  %v808_v43 = vsel %vm2281_vm14, %v1921_v48, 0.0  ;;  %vm2283_vm12 = vcmp.eq.s32.totalorder %v2265_v57, %v2282_v7  ;;  %vm2284_vm10 = vcmp.eq.s32.totalorder %v2268_v22, %v2282_v7 }
  0xbc   :  { %v809_v31 = vsel %vm2283_vm12, %v1912_v19, 0.0  ;;  %v810_v28 = vsel %vm2284_vm10, %v1921_v48, 0.0  ;;  %vm2286_vm6 = vcmp.eq.s32.totalorder %v2265_v57, %v2285_v37  ;;  %vm2287_vm8 = vcmp.eq.s32.totalorder %v2268_v22, %v2285_v37 }
  0xbd   :  { %v811_v32 = vsel %vm2286_vm6, %v1912_v19, 0.0  ;;  %v812_v62 = vsel %vm2287_vm8, %v1921_v48, 0.0  ;;  %vm2289_vm7 = vcmp.eq.s32.totalorder %v2265_v57, %v2288_v53  ;;  %vm2290_vm0 = vcmp.eq.s32.totalorder %v2268_v22, %v2288_v53 }
  0xbe   :  { %v813_v63 = vsel %vm2289_vm7, %v1912_v19, 0.0  ;;  %v814_v0 = vsel %vm2290_vm0, %v1921_v48, 0.0  ;;  %vm2291_vm11 = vcmask 64512  }
  0xbf   :  { %v815_v2 = vsel %vm2291_vm11, %v799_v9, 0.0  ;;  %vm2292_vm2 = vmmov %vm2291_vm11 }
  0xc0   :  { %v816_v30 = vsel %vm2292_vm2, %v800_v23, 0.0  ;;  %vm2293_vm5 = vmmov %vm2292_vm2 }
  0xc1   :  { %v824_v45 = vsel %vm2293_vm5, %v801_v40, 0.0  ;;  %v817_v24 = vadd.f32 %v816_v30, %v815_v2  ;;  %vm2294_vm9 = vmmov %vm2292_vm2 }
  0xc2   :  { %v825_v41 = vsel %vm2294_vm9, %v802_v21, 0.0  ;;  %vm2295_vm13 = vmmov %vm2292_vm2 }
  0xc3   :  { %v833_v47 = vsel %vm2295_vm13, %v803_v16, 0.0  ;;  %vm2296_vm15 = vmmov %vm2292_vm2  ;;  %v826_v49 = vadd.f32 %v825_v41, %v824_v45  ;;  %v818_v61 = vrot.slane %v817_v24, 4 }
  0xc4   :  { %v834_v3 = vsel %vm2296_vm15, %v804_v50, 0.0  ;;  %vm2297_vm1 = vmmov %vm2292_vm2 }
  0xc5   :  { %v835_v15 = vadd.f32 %v834_v3, %v833_v47  ;;  %v842_v18 = vsel %vm2297_vm1, %v805_v25, 0.0  ;;  %vm2298_vm3 = vmmov %vm2297_vm1  ;;  %v827_v54 = vrot.slane %v826_v49, 4  ;;  %v819_v46 = vadd.f32 %v818_v61, %v817_v24 }
  0xc6   :  { %v843_v59 = vsel %vm2298_vm3, %v806_v36, 0.0  ;;  %vm2299_vm4 = vmmov %vm2297_vm1 }
  0xc7   :  { %v844_v35 = vadd.f32 %v843_v59, %v842_v18  ;;  %v851_v33 = vsel %vm2299_vm4, %v807_v10, 0.0  ;;  %vm2300_vm14 = vmmov %vm2297_vm1  ;;  %v836_v58 = vrot.slane %v835_v15, 4  ;;  %v828_v5 = vadd.f32 %v827_v54, %v826_v49  ;;  %v2307_v18 = vld [vmem:[#allocation6_spill] sm:$0xff]  ;;  %v2309_v54 = vld [vmem:[#allocation15_spill] sm:$0xff] }
  0xc8   :  { %v852_v11 = vsel %vm2300_vm14, %v808_v43, 0.0  ;;  %vm2301_vm12 = vmmov %vm2297_vm1  ;;  %v820_v57 = vrot.slane %v819_v46, 2  ;;  %vm992_vm4 = vcmask 1041409   ;;  %vm995_vm14 = vcmask 1042434  }
  0xc9   :  { %v853_v4 = vadd.f32 %v852_v11, %v851_v33  ;;  %v860_v17 = vsel %vm2301_vm12, %v809_v31, 0.0  ;;  %v845_v6 = vrot.slane %v844_v35, 4  ;;  %vm2302_vm10 = vmmov %vm2297_vm1  ;;  %v837_v39 = vadd.f32 %v836_v58, %v835_v15  ;;  %v2308_v33 = vld [vmem:[#allocation14_spill] sm:$0xff] }
  0xca   :  { %v861_v1 = vsel %vm2302_vm10, %v810_v28, 0.0  ;;  %vm2303_vm6 = vmmov %vm2297_vm1  ;;  %v829_v23 = vrot.slane %v828_v5, 2  ;;  %v821_v42 = vadd.f32 %v820_v57, %v819_v46  ;;  %v2310_v46 = vld [vmem:[#allocation16_spill] sm:$0xff]  ;;  %vm998_vm12 = vcmask 1043459  }
  0xcb   :  { %v869_v38 = vsel %vm2303_vm6, %v811_v32, 0.0  ;;  %v854_v60 = vrot.slane %v853_v4, 4  ;;  %v862_v8 = vadd.f32 %v861_v1, %v860_v17  ;;  %v846_v12 = vadd.f32 %v845_v6, %v844_v35  ;;  %vm2304_vm8 = vmmov %vm2297_vm1 }
  0xcc   :  { %v870_v9 = vsel %vm2304_vm8, %v812_v62, 0.0  ;;  %vm2305_vm7 = vmmov %vm2297_vm1  ;;  %v838_v52 = vrot.slane %v837_v39, 2  ;;  %v830_v25 = vadd.f32 %v829_v23, %v828_v5  ;;  %v822_v43 = vrot.slane %v821_v42, 1  ;;  %v2311_v5 = vld [vmem:[#allocation17_spill] sm:$0xff]  ;;  %v2314_v23 = vld [vmem:[#allocation18_spill] sm:$0xff] }
  0xcd   :  { %v878_v22 = vsel %vm2305_vm7, %v813_v63, 0.0  ;;  %v855_v40 = vadd.f32 %v854_v60, %v853_v4  ;;  %v863_v21 = vrot.slane %v862_v8, 4  ;;  %v847_v16 = vrot.slane %v846_v12, 2  ;;  %vm2306_vm0 = vmmov %vm2297_vm1 }
  0xce   :  { %v871_v50 = vadd.f32 %v870_v9, %v869_v38  ;;  %v879_v14 = vsel %vm2306_vm0, %v814_v0, 0.0  ;;  %v839_v36 = vadd.f32 %v838_v52, %v837_v39  ;;  %v831_v37 = vrot.slane %v830_v25, 1 }
  0xcf   :  { %v856_v29 = vrot.slane %v855_v40, 2  ;;  %v864_v10 = vadd.f32 %v863_v21, %v862_v8  ;;  %v848_v7 = vadd.f32 %v847_v16, %v846_v12  ;;  %v880_v28 = vadd.f32 %v879_v14, %v878_v22 }
  0xd0   :  { %v872_v31 = vrot.slane %v871_v50, 4  ;;  %v840_v32 = vrot.slane %v839_v36, 1  ;;  %v823_v63 = vadd.f32 %v822_v43, %v821_v42  ;;  %v832_v24 = vadd.f32 %v831_v37, %v830_v25 }
  0xd1   :  { %v857_v62 = vadd.f32 %v856_v29, %v855_v40  ;;  %v865_v53 = vrot.slane %v864_v10, 2  ;;  %v849_v2 = vrot.slane %v848_v7, 1  ;;  %v881_v45 = vrot.slane %v880_v28, 4 }
  0xd2   :  { %v873_v30 = vadd.f32 %v872_v31, %v871_v50  ;;  %v841_v41 = vadd.f32 %v840_v32, %v839_v36  ;;  %v887_v59 = vsub.f32 %v2307_v18, %v823_v63  ;;  %v888_v11 = vsub.f32 %v2308_v33, %v832_v24  ;;  %v2323_v31 = vld [vmem:[#allocation19_spill] sm:$0xff] }
  0xd3   :  { %v858_v47 = vrot.slane %v857_v62, 1  ;;  %v866_v0 = vadd.f32 %v865_v53, %v864_v10  ;;  %v850_v3 = vadd.f32 %v849_v2, %v848_v7  ;;  %v882_v15 = vadd.f32 %v881_v45, %v880_v28 }
  0xd4   :  { %v874_v49 = vrot.slane %v873_v30, 2  ;;  %v889_v58 = vsub.f32 %v2309_v54, %v841_v41  ;;  %v895_v1 = vand.u32 2147483647, %v887_v59  ;;  %v896_v60 = vand.u32 2147483647, %v888_v11 }
  0xd5   :  { %v859_v61 = vadd.f32 %v858_v47, %v857_v62  ;;  %v867_v35 = vrot.slane %v866_v0, 1  ;;  %v883_v17 = vrot.slane %v882_v15, 2  ;;  %v890_v6 = vsub.f32 %v2310_v46, %v850_v3 }
  0xd6   :  { %v875_v4 = vadd.f32 %v874_v49, %v873_v30  ;;  %v897_v8 = vand.u32 2147483647, %v889_v58  ;;  %vm2004_vm11 = vcmp.lt.f32.partialorder %v895_v1, 1.0  ;;  %vm2009_vm2 = vcmp.lt.f32.partialorder %v896_v60, 1.0 }
  0xd7   :  { %v868_v38 = vadd.f32 %v867_v35, %v866_v0  ;;  %v891_v39 = vsub.f32 %v2311_v5, %v859_v61  ;;  %v884_v12 = vadd.f32 %v883_v17, %v882_v15  ;;  %v898_v9 = vand.u32 2147483647, %v890_v6 }
  0xd8   :  { %v876_v57 = vrot.slane %v875_v4, 1  ;;  %vm2013_vm5 = vcmp.lt.f32.partialorder %v897_v8, 1.0  ;;  %v911_v25 = vmul.f32 0.5, %v887_v59  ;;  %v912_v10 = vmul.f32 0.5, %v888_v11 }
  0xd9   :  { %v892_v52 = vsub.f32 %v2314_v23, %v868_v38  ;;  %v899_v40 = vand.u32 2147483647, %v891_v39  ;;  %v885_v50 = vrot.slane %v884_v12, 1  ;;  %vm2017_vm9 = vcmp.lt.f32.partialorder %v898_v9, 1.0 }
  0xda   :  { %v877_v16 = vadd.f32 %v876_v57, %v875_v4  ;;  %v913_v43 = vmul.f32 0.5, %v889_v58  ;;  %v914_v37 = vmul.f32 0.5, %v890_v6  ;;  %v915_v32 = vmul.f32 0.5, %v891_v39 }
  0xdb   :  { %v900_v36 = vand.u32 2147483647, %v892_v52  ;;  %vm2021_vm13 = vcmp.lt.f32.partialorder %v899_v40, 1.0  ;;  %v886_v7 = vadd.f32 %v885_v50, %v884_v12  ;;  %v916_v53 = vmul.f32 0.5, %v892_v52 }
  0xdc   :  { %v893_v28 = vsub.f32 %v2323_v31, %v877_v16  ;;  %v919_v63 = vmul.f32 %v911_v25, %v887_v59  ;;  %v920_v2 = vmul.f32 %v912_v10, %v888_v11  ;;  %v921_v41 = vmul.f32 %v913_v43, %v889_v58 }
  0xdd   :  { %vm2026_vm15 = vcmp.lt.f32.partialorder %v900_v36, 1.0  ;;  %v894_v30 = vsub.f32 %v1826_v26, %v886_v7  ;;  %v922_v47 = vmul.f32 %v914_v37, %v890_v6  ;;  %v923_v0 = vmul.f32 %v915_v32, %v891_v39 }
  0xde   :  { %v901_v45 = vand.u32 2147483647, %v893_v28  ;;  %v917_v24 = vmul.f32 0.5, %v893_v28  ;;  %v924_v3 = vmul.f32 %v916_v53, %v892_v52  ;;  %v1117_v49 = vadd.f32 -0.5, %v895_v1 }
  0xdf   :  { %v902_v15 = vand.u32 2147483647, %v894_v30  ;;  %v918_v35 = vmul.f32 0.5, %v894_v30  ;;  %v1118_v17 = vadd.f32 -0.5, %v896_v60  ;;  %v1119_v38 = vadd.f32 -0.5, %v897_v8 }
  0xe0   :  { %vm2031_vm1 = vcmp.lt.f32.partialorder %v901_v45, 1.0  ;;  %v925_v4 = vmul.f32 %v917_v24, %v893_v28  ;;  %v1120_v59 = vadd.f32 -0.5, %v898_v9  ;;  %v1121_v11 = vadd.f32 -0.5, %v899_v40 }
  0xe1   :  { %vm2035_vm3 = vcmp.lt.f32.partialorder %v902_v15, 1.0  ;;  %v926_v58 = vmul.f32 %v918_v35, %v894_v30  ;;  %v1122_v6 = vadd.f32 -0.5, %v900_v36  ;;  %v1123_v39 = vadd.f32 -0.5, %v901_v45 }
  0xe2   :  { %v1124_v12 = vadd.f32 -0.5, %v902_v15  ;;  %v935_v1 = vsel %vm2004_vm11, %v919_v63, %v1117_v49  ;;  %v936_v52 = vsel %vm2009_vm2, %v920_v2, %v1118_v17  ;;  %v937_v60 = vsel %vm2013_vm5, %v921_v41, %v1119_v38 }
  0xe3   :  { %v938_v8 = vsel %vm2017_vm9, %v922_v47, %v1120_v59  ;;  %v939_v9 = vsel %vm2021_vm13, %v923_v0, %v1121_v11  ;;  %v940_v40 = vsel %vm2026_vm15, %v924_v3, %v1122_v6  ;;  %v941_v16 = vsel %vm2031_vm1, %v925_v4, %v1123_v39  ;;  %v1139_v11 = vld [vmem:[%s2114_s1 + $0x18] sm:$0xff] }
  0xe4   :  { %v942_v22 = vsel %vm2035_vm3, %v926_v58, %v1124_v12  ;;  %v951_v21 = vrot.slane %v935_v1, 2  ;;  %v952_v50 = vrot.slane %v936_v52, 2  ;;  %v953_v25 = vrot.slane %v937_v60, 2 }
  0xe5   :  { %v954_v42 = vrot.slane %v938_v8, 2  ;;  %v955_v36 = vrot.slane %v939_v9, 2  ;;  %v956_v10 = vrot.slane %v940_v40, 2  ;;  %v957_v14 = vrot.slane %v941_v16, 2 }
  0xe6   :  { %v958_v43 = vrot.slane %v942_v22, 2  ;;  %v967_v29 = vadd.f32 %v951_v21, %v1858_v51  ;;  %v968_v7 = vadd.f32 %v952_v50, %v1865_v34  ;;  %v969_v28 = vadd.f32 %v953_v25, %v1872_v27 }
  0xe7   :  { %v970_v37 = vadd.f32 %v954_v42, %v1879_v13  ;;  %v971_v32 = vadd.f32 %v955_v36, %v1886_v44  ;;  %v972_v62 = vadd.f32 %v956_v10, %v1893_v55  ;;  %v973_v53 = vadd.f32 %v957_v14, %v1900_v56 }
  0xe8   :  { %v974_v63 = vadd.f32 %v958_v43, %v1907_v20  ;;  %v991_v2 = vrot.slane %v968_v7, 7  ;;  %v994_v30 = vrot.slane %v969_v28, 6  ;;  %vm1001_vm10 = vcmask 1044484  }
  0xe9   :  { %v997_v45 = vrot.slane %v970_v37, 5  ;;  %v1000_v51 = vrot.slane %v971_v32, 4  ;;  %v1003_v27 = vrot.slane %v972_v62, 3  ;;  %vm1004_vm6 = vcmask 1045509  }
  0xea   :  { %v993_v34 = vsel %vm992_vm4, %v991_v2, %v967_v29  ;;  %v1006_v44 = vrot.slane %v973_v53, 2  ;;  %vm1007_vm8 = vcmask 1046534   ;;  %v1009_v56 = vrot.slane %v974_v63, 1 }
  0xeb   :  { %v996_v13 = vsel %vm995_vm14, %v994_v30, %v993_v34  ;;  %vm1010_vm7 = vcmask 1047559   ;;  %vm1023_vm0 = vcmask 59392   ;;  %vm2330_vm11 = vcmask 64512  }
  0xec   :  { %v999_v55 = vsel %vm998_vm12, %v997_v45, %v996_v13  ;;  %v1024_v24 = vsel %vm1023_vm0, %v2307_v18, 0.0  ;;  %v1025_v41 = vsel %vm1023_vm0, %v2308_v33, 0.0  ;;  %v1027_v47 = vsel %vm1023_vm0, %v2309_v54, 0.0  ;;  %v1136_v18 = vld [vmem:[%s2114_s1] sm:$0xff]  ;;  %v1137_v54 = vld [vmem:[%s2114_s1 + $0x8] sm:$0xff]  ;;  %vm2331_vm2 = vmmov %vm2330_vm11 }
  0xed   :  { %v1002_v20 = vsel %vm1001_vm10, %v1000_v51, %v999_v55  ;;  %v1026_v3 = vadd.f32 %v1025_v41, %v1024_v24  ;;  %v1029_v15 = vsel %vm1023_vm0, %v2310_v46, 0.0  ;;  %v1031_v61 = vsel %vm1023_vm0, %v2311_v5, 0.0  ;;  %vm2332_vm5 = vmmov %vm2331_vm2  ;;  %v1138_v5 = vld [vmem:[%s2114_s1 + $0x10] sm:$0xff] }
  0xee   :  { %v1005_v0 = vsel %vm1004_vm6, %v1003_v27, %v1002_v20  ;;  %v1041_v33 = vsel %vm2330_vm11, %v1136_v18, 0.0  ;;  %v1042_v17 = vsel %vm2331_vm2, %v1137_v54, 0.0  ;;  %vm2333_vm9 = vmmov %vm2331_vm2  ;;  %v1033_v1 = vsel %vm1023_vm0, %v2314_v23, 0.0 }
  0xef   :  { %v1008_v49 = vsel %vm1007_vm8, %v1006_v44, %v1005_v0  ;;  %v1028_v4 = vadd.f32 %v1027_v47, %v1026_v3  ;;  %v1043_v46 = vadd.f32 %v1042_v17, %v1041_v33  ;;  %v1050_v59 = vsel %vm2333_vm9, %v1138_v5, 0.0  ;;  %vm2334_vm13 = vmmov %vm2331_vm2 }
  0xf0   :  { %v1011_v35 = vsel %vm1010_vm7, %v1009_v56, %v1008_v49  ;;  %v1051_v57 = vsel %vm2334_vm13, %v1139_v11, 0.0  ;;  %vm2335_vm15 = vmmov %vm2331_vm2  ;;  %v1035_v22 = vsel %vm1023_vm0, %v2323_v31, 0.0  ;;  %vm1021_vm3 = vcmask 57344  }
  0xf1   :  { %v1013_v38 = vsel %vm2332_vm5, %v1011_v35, 0.0  ;;  %v1030_v6 = vadd.f32 %v1029_v15, %v1028_v4  ;;  %v1052_v39 = vadd.f32 %v1051_v57, %v1050_v59  ;;  %v1059_v12 = vsel %vm2335_vm15, %v1912_v19, 0.0  ;;  %vm2336_vm1 = vmmov %vm2331_vm2 }
  0xf2   :  { %v1014_v58 = vrot.slane %v1013_v38, 4  ;;  %v1044_v52 = vrot.slane %v1043_v46, 4  ;;  %v1060_v60 = vsel %vm2336_vm1, %v1921_v48, 0.0  ;;  %v1037_v48 = vsel %vm1023_vm0, %v1826_v26, 0.0 }
  0xf3   :  { %v1032_v9 = vadd.f32 %v1031_v61, %v1030_v6  ;;  %v1053_v40 = vrot.slane %v1052_v39, 4  ;;  %v1061_v16 = vadd.f32 %v1060_v60, %v1059_v12 }
  0xf4   :  { %v1015_v8 = vadd.f32 %v1014_v58, %v1013_v38  ;;  %v1045_v21 = vadd.f32 %v1044_v52, %v1043_v46 }
  0xf5   :  { %v1034_v25 = vadd.f32 %v1033_v1, %v1032_v9  ;;  %v1054_v42 = vadd.f32 %v1053_v40, %v1052_v39  ;;  %v1062_v36 = vrot.slane %v1061_v16, 4 }
  0xf6   :  { %v1016_v50 = vrot.slane %v1015_v8, 2  ;;  %v1046_v19 = vrot.slane %v1045_v21, 2 }
  0xf7   :  { %v1055_v14 = vrot.slane %v1054_v42, 2  ;;  %v1063_v23 = vadd.f32 %v1062_v36, %v1061_v16  ;;  %v1036_v43 = vadd.f32 %v1035_v22, %v1034_v25 }
  0xf8   :  { %v1017_v10 = vadd.f32 %v1016_v50, %v1015_v8  ;;  %v1047_v29 = vadd.f32 %v1046_v19, %v1045_v21 }
  0xf9   :  { %v1056_v28 = vadd.f32 %v1055_v14, %v1054_v42  ;;  %v1064_v37 = vrot.slane %v1063_v23, 2  ;;  %v1038_v63 = vadd.f32 %v1037_v48, %v1036_v43 }
  0xfa   :  { %v1018_v7 = vrot.slane %v1017_v10, 1  ;;  %v1048_v32 = vrot.slane %v1047_v29, 1 }
  0xfb   :  { %v1057_v31 = vrot.slane %v1056_v28, 1  ;;  %v1065_v53 = vadd.f32 %v1064_v37, %v1063_v23  ;;  %v1040_v13 = vmul.f32 0.125, %v1038_v63 }
  0xfc   :  { %v1019_v62 = vadd.f32 %v1018_v7, %v1017_v10  ;;  %v1049_v2 = vadd.f32 %v1048_v32, %v1047_v29 }
  0xfd   :  { %v1058_v45 = vadd.f32 %v1057_v31, %v1056_v28  ;;  %v1066_v51 = vrot.slane %v1065_v53, 1 }
  0xfe   :  { %v1020_v30 = vmul.f32 0.041666668, %v1019_v62  ;;  %v1069_v34 = vmul.f32 0.0625, %v1049_v2 }
  0xff   :  { %v1067_v27 = vadd.f32 %v1066_v51, %v1065_v53  ;;  %v1070_v26 = vmul.f32 0.0625, %v1058_v45 }
 0x100   :  { %1022 = vst.msk [vmem:[%s2115_s2] sm:$0x1] %vm1021_vm3, %v1020_v30 }
 0x101   :  { %v1071_v44 = vmul.f32 0.0625, %v1067_v27  ;;  %v1075_v55 = vsel %vm992_vm4, %v1070_v26, %v1069_v34 }
 0x103   :  { %v1076_v56 = vsel %vm995_vm14, %v1071_v44, %v1075_v55 }
 0x104   :  { %v1078_v20 = vsub.f32 %v1040_v13, %v1076_v56 }
 0x106   :  { %v1079_v24 = vand.u32 2147483647, %v1078_v20  ;;  %v1081_v41 = vmul.f32 0.5, %v1078_v20 }
 0x108   :  { %vm1080_vm12 = vcmp.lt.f32.partialorder %v1079_v24, 1.0  ;;  %v1082_v47 = vmul.f32 %v1081_v41, %v1078_v20  ;;  %v1125_v0 = vadd.f32 -0.5, %v1079_v24 }
 0x10a   :  { %v1084_v3 = vsel %vm1080_vm12, %v1082_v47, %v1125_v0 }
 0x10b   :  { %v1085_v49 = vsel %vm1023_vm0, %v1084_v3, 0.0 }
 0x10c   :  { %v1086_v15 = vrot.slane %v1085_v49, 4 }
 0x10e   :  { %v1087_v61 = vadd.f32 %v1086_v15, %v1085_v49 }
 0x110   :  { %v1088_v35 = vrot.slane %v1087_v61, 2 }
 0x112   :  { %v1089_v4 = vadd.f32 %v1088_v35, %v1087_v61 }
 0x114   :  { %v1090_v18 = vrot.slane %v1089_v4, 1 }
 0x116   :  { %v1091_v33 = vadd.f32 %v1090_v18, %v1089_v4 }
 0x118   :  { %1092 = vst.msk [vmem:[%s2116_s3] sm:$0x1] %vm1021_vm3, %v1091_v33 }

</bundles_post_ra>
